<compile_context>
chip_gen: v6e
topology: v6e:2x2x1
jax: 0.10.0
libtpu: 0.0.40
codegen_flags: <defaults>
</compile_context>

<pallas_src>
import math

import jax
import jax.numpy as jnp
from jax import lax
from jax.experimental import pallas as pl
from jax.experimental.pallas import tpu as pltpu


# ----------------------------------------------------------------------------
# Glue: grid construction (Conversion.XY2xyz) and axis-angle -> rotation matrix
# ----------------------------------------------------------------------------
def _xy_grid_to_xyz(equ_h: int) -> jnp.ndarray:
    """Conversion.XY2xyz: pixel grid -> unit-sphere xyz, shape (3, H*W).

    # TODO(synk): BiFusev2's Conversion.py is not included in the snippet; the
    # pixel->lonlat convention is reconstructed as the align_corners=True
    # consistent one (identity rotation == identity resample):
    #   lon = (X/(W-1) - 0.5) * 2*pi,  lat = (Y/(H-1) - 0.5) * pi
    #   x = cos(lat)sin(lon), y = sin(lat), z = cos(lat)cos(lon)
    """
    equ_w = 2 * equ_h
    X = jnp.arange(equ_w, dtype=jnp.float32)[None, :]
    Y = jnp.arange(equ_h, dtype=jnp.float32)[:, None]
    lon = jnp.broadcast_to((X / (equ_w - 1) - 0.5) * (2.0 * math.pi), (equ_h, equ_w))
    lat = jnp.broadcast_to((Y / (equ_h - 1) - 0.5) * math.pi, (equ_h, equ_w))
    x = jnp.cos(lat) * jnp.sin(lon)
    y = jnp.sin(lat)
    z = jnp.cos(lat) * jnp.cos(lon)
    return jnp.stack([x, y, z], axis=0).reshape(3, equ_h * equ_w)  # (3, P)


def angle_axis_to_rotation_matrix(axis_angle: jnp.ndarray) -> jnp.ndarray:
    """Rodrigues formula (kornia-style, Taylor fallback): (B, 3) -> (B, 3, 3)."""
    aa = jnp.asarray(axis_angle, jnp.float32)
    t = jnp.sqrt(jnp.sum(aa * aa, axis=-1))
    safe_t = jnp.where(t > 1e-12, t, 1.0)
    a = jnp.where(t > 1e-12, jnp.sin(safe_t) / safe_t, 1.0)
    b = jnp.where(t > 1e-12, (1.0 - jnp.cos(safe_t)) / (safe_t * safe_t), 0.5)
    wx, wy, wz = aa[:, 0], aa[:, 1], aa[:, 2]
    zeros = jnp.zeros_like(wx)
    K = jnp.stack(
        [jnp.stack([zeros, -wz, wy], axis=-1),
         jnp.stack([wz, zeros, -wx], axis=-1),
         jnp.stack([-wy, wx, zeros], axis=-1)],
        axis=-2,
    )  # (B, 3, 3)
    I = jnp.eye(3, dtype=jnp.float32)[None]
    return I + a[:, None, None] * K + b[:, None, None] * (K @ K)


def _round_up(x: int, m: int) -> int:
    return ((x + m - 1) // m) * m


def _cdiv(a: int, b: int) -> int:
    return (a + b - 1) // b


# ----------------------------------------------------------------------------
# Pallas kernel: sparse gather-as-matmul over only the touched input chunks
# ----------------------------------------------------------------------------
def _make_sample_kernel(C: int, W_in: int, TQ: int, TP: int, nK: int, compute_dtype):
    def kernel(cstart_ref, ccount_ref,        # scalar prefetch (SMEM): (B, nP)
               idx_ref, wgt_ref, img_hbm,     # inputs
               out_ref,                       # output
               imgbuf, sem, acc_ref):         # scratch
        b = pl.program_id(0)
        p = pl.program_id(1)
        # scalar reads before any DMA wait (keeps SMEM forwarding intact)
        c0 = cstart_ref[b, p]                 # first touched chunk of this tile
        n = ccount_ref[b, p]                  # number of touched chunks (>= 1)
        base_chunk = b * nK + c0              # flat chunk index in img_hbm

        def fetch(ci, slot):
            pltpu.make_async_copy(img_hbm.at[base_chunk + ci],
                                  imgbuf.at[slot], sem.at[slot]).start()

        fetch(0, 0)                           # prime the pipeline
        acc_ref[...] = jnp.zeros_like(acc_ref)

        # per-tile (loop-invariant) sampling data, hoisted out of the chunk loop
        f00 = idx_ref[0]                      # (1, TP) int32: flat index of corner (y0,x0)
        w = wgt_ref[0]                        # (4, TP) f32 bilinear weights
        w00 = w[0:1]; w01 = w[1:2]; w10 = w[2:3]; w11 = w[3:4]
        q_iota = lax.broadcasted_iota(jnp.int32, (TQ, TP), 0)   # built once per tile

        @pl.loop(0, n)
        def _(ci):
            slot = ci & 1
            # wait for the chunk we are about to use
            pltpu.make_async_copy(img_hbm.at[0], imgbuf.at[slot], sem.at[slot]).wait()

            @pl.when(ci + 1 < n)
            def _():
                fetch(ci + 1, 1 - slot)       # prefetch next chunk into other slot

            # local (within-chunk) offset of corner (y0,x0) for every output pixel
            b0 = f00 - (c0 + ci) * TQ         # (1, TP) int32
            # Border handling: F.grid_sample only "clamps" a corner when u==W-1
            # or v==H-1 exactly, in which case its bilinear weight is exactly 0,
            # so the unclamped constant offsets {0, 1, W, W+1} are equivalent.
            wmat = jnp.where(q_iota == b0, w00,
                   jnp.where(q_iota == b0 + 1, w01,
                   jnp.where(q_iota == b0 + W_in, w10,
                   jnp.where(q_iota == b0 + (W_in + 1), w11, 0.0))))   # (TQ, TP)

            acc_ref[...] += lax.dot_general(
                imgbuf[slot].astype(compute_dtype), wmat.astype(compute_dtype),
                (((1,), (0,)), ((), ())),
                preferred_element_type=jnp.float32)                    # (C, TP)

        out_ref[0] = acc_ref[...].astype(out_ref.dtype)

    return kernel


# ----------------------------------------------------------------------------
# Module wrapper
# ----------------------------------------------------------------------------
class EquirecRotate:
    def __init__(self, equ_h: int, compute_dtype=jnp.float32):
        self.equ_h = equ_h
        self.equ_w = equ_h * 2
        # set compute_dtype=jnp.bfloat16 on v6e/v7x to halve image DMA bytes and
        # use native bf16 MXU passes (f32 accumulation kept); default f32
        # matches PyTorch numerics.
        self.compute_dtype = compute_dtype
        self.grid_flat = _xy_grid_to_xyz(equ_h)                 # (3, P)

    def __call__(self, equi, axis_angle=None, rotation_matrix=None, mode='bilinear'):
        assert mode in ('nearest', 'bilinear')
        equi = jnp.asarray(equi)
        B, C, H_in, W_in = equi.shape
        if axis_angle is not None:
            R = angle_axis_to_rotation_matrix(axis_angle)
        else:
            R = jnp.asarray(rotation_matrix, jnp.float32)

        P = self.equ_h * self.equ_w          # output pixels
        Q = H_in * W_in                      # input pixels

        # ---- per-output-pixel mapping (hoisted out of the kernel, like the
        #      original module computes its grid before F.grid_sample) --------
        g = self.grid_flat                                           # (3, P)
        xyz = jnp.einsum('bij,jp->bip', R.astype(jnp.float32), g)    # (B, 3, P)
        x, y, z = xyz[:, 0], xyz[:, 1], xyz[:, 2]
        lon = jnp.arctan2(x, z)
        lat = jnp.arctan2(y, jnp.sqrt(jnp.maximum(1.0 - y * y, 0.0)))
        # normalize to input pixel coords (align_corners=True); clamped, not
        # wrapped, at the longitude seam -- matches F.grid_sample padding.
        u = jnp.clip((lon / math.pi + 1.0) * (0.5 * (W_in - 1)), 0.0, W_in - 1.0)
        v = jnp.clip((lat * 2.0 / math.pi + 1.0) * (0.5 * (H_in - 1)), 0.0, H_in - 1.0)

        if mode == 'bilinear':
            x0 = jnp.floor(u); y0 = jnp.floor(v)
            wx = u - x0;       wy = v - y0
            f00 = y0.astype(jnp.int32) * W_in + x0.astype(jnp.int32)         # (B, P)
            wgt = jnp.stack([(1.0 - wx) * (1.0 - wy), wx * (1.0 - wy),
                             (1.0 - wx) * wy,         wx * wy], axis=1)       # (B, 4, P)
            corner_span = W_in + 1
        else:  # nearest
            xn = jnp.clip(jnp.round(u), 0.0, W_in - 1.0).astype(jnp.int32)
            yn = jnp.clip(jnp.round(v), 0.0, H_in - 1.0).astype(jnp.int32)
            f00 = yn * W_in + xn
            wgt = jnp.stack([jnp.ones_like(u), jnp.zeros_like(u),
                             jnp.zeros_like(u), jnp.zeros_like(u)], axis=1)
            corner_span = 0
        idx = f00[:, None, :]                                                 # (B, 1, P)

        # ---- tiling: pad P and Q to tile multiples (never full-array tiles) --
        TP = min(1024, _round_up(P, 128))
        if B * _cdiv(P, TP) < 2 and TP > 128:      # keep >=2 parallel tiles (v7x 2 TCs)
            TP = _round_up(_cdiv(P, 2), 128)
        P_pad = _round_up(P, TP)
        TQ = min(256, _round_up(Q, 128))
        Q_pad = _round_up(Q, TQ)
        nP = P_pad // TP
        nK = Q_pad // TQ

        pad_p = P_pad - P
        idx_p = jnp.pad(idx, ((0, 0), (0, 0), (0, pad_p)), mode='edge')
        wgt_p = jnp.pad(wgt.astype(jnp.float32), ((0, 0), (0, 0), (0, pad_p)))

        # per-(batch, output-tile) touched input-chunk range (scalar prefetch)
        idx_t = idx_p.reshape(B, nP, TP)
        c_start = (idx_t.min(-1) // TQ).astype(jnp.int32)                     # (B, nP)
        last = jnp.minimum(idx_t.max(-1) + corner_span, Q - 1)
        c_count = (last // TQ - c_start + 1).astype(jnp.int32)                # (B, nP)

        # image as contiguous (C, TQ) chunk slabs: (B*nK, C, TQ)
        img = equi.astype(self.compute_dtype).reshape(B, C, Q)
        img = jnp.pad(img, ((0, 0), (0, 0), (0, Q_pad - Q)))
        img = img.reshape(B, C, nK, TQ).transpose(0, 2, 1, 3).reshape(B * nK, C, TQ)

        # VMEM budget: (TQ,TP) intermediates + buffers; capped at 48 MiB (v7x-safe)
        item = jnp.dtype(self.compute_dtype).itemsize
        tile_bytes = (8 * TQ * TP * 4 + 2 * C * TQ * item + C * TP * 4
                      + 2 * (1 + 4 + C) * TP * 4)
        vmem_limit = int(min(48 << 20, max(16 << 20, tile_bytes + (8 << 20))))

        kernel = _make_sample_kernel(C, W_in, TQ, TP, nK, self.compute_dtype)
        out_flat = pl.pallas_call(
            kernel,
            out_shape=jax.ShapeDtypeStruct((B, C, P_pad), jnp.float32),
            grid_spec=pltpu.PrefetchScalarGridSpec(
                num_scalar_prefetch=2,
                grid=(B, nP),
                in_specs=[
                    pl.BlockSpec((1, 1, TP), lambda b, p, cs, cc: (b, 0, p)),  # idx
                    pl.BlockSpec((1, 4, TP), lambda b, p, cs, cc: (b, 0, p)),  # weights
                    pl.BlockSpec(memory_space=pl.ANY),                          # image (HBM)
                ],
                out_specs=pl.BlockSpec((1, C, TP), lambda b, p, cs, cc: (b, 0, p)),
                scratch_shapes=[
                    pltpu.VMEM((2, C, TQ), self.compute_dtype),   # image double buffer
                    pltpu.SemaphoreType.DMA((2,)),
                    pltpu.VMEM((C, TP), jnp.float32),             # accumulator
                ]),
            compiler_params=pltpu.CompilerParams(
                dimension_semantics=("parallel", "parallel"),
                vmem_limit_bytes=vmem_limit),
        )(c_start, c_count, idx_p, wgt_p, img)

        return out_flat[:, :, :P].reshape(B, C, self.equ_h, self.equ_w)


# ----------------------------------------------------------------------------
# Pure-JAX (non-Pallas) reference of the same math, for sanity checking.
# ----------------------------------------------------------------------------
def _reference_rotate(equi, R, grid_flat, mode):
    B, C, H_in, W_in = equi.shape
    g = grid_flat                                       # (3, P)
    xyz = jnp.einsum('bij,jp->bip', R, g)               # (B, 3, P)
    x, y, z = xyz[:, 0], xyz[:, 1], xyz[:, 2]
    lon = jnp.arctan2(x, z)
    lat = jnp.arctan2(y, jnp.sqrt(jnp.maximum(1.0 - y * y, 0.0)))
    u = jnp.clip((lon / math.pi + 1.0) * 0.5 * (W_in - 1), 0.0, W_in - 1.0)
    v = jnp.clip((lat * 2.0 / math.pi + 1.0) * 0.5 * (H_in - 1), 0.0, H_in - 1.0)
    img = equi.reshape(B, C, H_in * W_in)
    P = g.shape[1]

    def gat(yy, xx):
        idx = jnp.broadcast_to((yy * W_in + xx)[:, None, :], (B, C, P))
        return jnp.take_along_axis(img, idx, axis=2)

    if mode == 'bilinear':
        x0 = jnp.floor(u); y0 = jnp.floor(v)
        wx = u - x0; wy = v - y0
        x0i = x0.astype(jnp.int32); y0i = y0.astype(jnp.int32)
        x1i = jnp.minimum(x0i + 1, W_in - 1); y1i = jnp.minimum(y0i + 1, H_in - 1)
        out = (gat(y0i, x0i) * ((1 - wx) * (1 - wy))[:, None, :]
               + gat(y0i, x1i) * (wx * (1 - wy))[:, None, :]
               + gat(y1i, x0i) * ((1 - wx) * wy)[:, None, :]
               + gat(y1i, x1i) * (wx * wy)[:, None, :])
    else:
        xn = jnp.clip(jnp.round(u), 0, W_in - 1).astype(jnp.int32)
        yn = jnp.clip(jnp.round(v), 0, H_in - 1).astype(jnp.int32)
        out = gat(yn, xn)
    return out  # (B, C, P)


if __name__ == "__main__":
    key = jax.random.PRNGKey(0)
    k_img, k_rot = jax.random.split(key)

    equ_h = 16
    B, C = 2, 4
    equi = jax.random.normal(k_img, (B, C, equ_h, 2 * equ_h), dtype=jnp.float32)
    axis_angle = 0.3 * jax.random.normal(k_rot, (B, 3), dtype=jnp.float32)

    module = EquirecRotate(equ_h)
    out_bl = jax.block_until_ready(module(equi, axis_angle=axis_angle, mode='bilinear'))
    out_nn = jax.block_until_ready(module(equi, axis_angle=axis_angle, mode='nearest'))

    assert out_bl.shape == (B, C, equ_h, 2 * equ_h)
    assert out_nn.shape == (B, C, equ_h, 2 * equ_h)
    assert bool(jnp.all(jnp.isfinite(out_bl)))
    assert bool(jnp.all(jnp.isfinite(out_nn)))

    # bilinear is continuous in (u, v), so a generous tolerance is robust to
    # MXU f32 rounding / transcendental ulp differences between lowerings.
    R = angle_axis_to_rotation_matrix(axis_angle)
    ref = _reference_rotate(equi, R, module.grid_flat, 'bilinear').reshape(out_bl.shape)
    max_err = float(jnp.max(jnp.abs(out_bl - ref)))
    assert max_err < 3e-2, f"bilinear max abs err vs reference: {max_err}"

    print("KERNEL_OK")
</pallas_src>

<mosaic_0001>
module attributes {stable_mosaic.version = 11 : i64} {
  func.func @kernel(%arg0: i32, %arg1: i32, %arg2: memref<2x1xi32, #tpu.memory_space<smem>>, %arg3: memref<2x1xi32, #tpu.memory_space<smem>>, %arg4: memref<1x1x512xi32, #tpu.memory_space<vmem>>, %arg5: memref<1x4x512xf32, #tpu.memory_space<vmem>>, %arg6: memref<4x4x256xf32, #tpu.memory_space<any>>, %arg7: memref<1x4x512xf32, #tpu.memory_space<vmem>>, %arg8: memref<2x4x256xf32, #tpu.memory_space<vmem>>, %arg9: memref<2x!tpu.dma_semaphore, #tpu.memory_space<semaphore_mem>>, %arg10: memref<4x512xf32, #tpu.memory_space<vmem>>) attributes {dimension_semantics = [#tpu.dimension_semantics<parallel>, #tpu.dimension_semantics<parallel>], iteration_bounds = array<i64: 2, 1>, scalar_prefetch = 2 : i64, scratch_operands = 3 : i64, tpu.core_type = #tpu.core_type<tc>, window_params = [{transform_indices = @transform_0, window_bounds = array<i64: 1, 1, 512>}, {transform_indices = @transform_1, window_bounds = array<i64: 1, 4, 512>}, {}, {transform_indices = @transform_3, window_bounds = array<i64: 1, 4, 512>}]} {
    %0 = arith.index_cast %arg0 : i32 to index
    %1 = arith.index_cast %arg1 : i32 to index
    %2 = memref.load %arg2[%0, %1] : memref<2x1xi32, #tpu.memory_space<smem>>
    %3 = arith.index_cast %arg0 : i32 to index
    %4 = arith.index_cast %arg1 : i32 to index
    %5 = memref.load %arg3[%3, %4] : memref<2x1xi32, #tpu.memory_space<smem>>
    %c2_i32 = arith.constant 2 : i32
    %6 = arith.muli %arg0, %c2_i32 : i32
    %7 = arith.addi %6, %2 : i32
    %c0_i32 = arith.constant 0 : i32
    %8 = arith.addi %7, %c0_i32 : i32
    %c0_i32_0 = arith.constant 0 : i32
    %c0_i32_1 = arith.constant 0 : i32
    %c0_i32_2 = arith.constant 0 : i32
    %c0_i32_3 = arith.constant 0 : i32
    %9 = tpu.memref_slice %arg6[%8, %c0_i32_2, %c0_i32_3] : memref<4x4x256xf32, #tpu.memory_space<any>> -> memref<1x4x256xf32, #tpu.memory_space<any>>
    %10 = tpu.memref_squeeze %9 : memref<1x4x256xf32, #tpu.memory_space<any>> -> memref<4x256xf32, #tpu.memory_space<any>>
    %c0_i32_4 = arith.constant 0 : i32
    %c0_i32_5 = arith.constant 0 : i32
    %11 = tpu.memref_slice %arg8[%c0_i32_0, %c0_i32_4, %c0_i32_5] : memref<2x4x256xf32, #tpu.memory_space<vmem>> -> memref<1x4x256xf32, #tpu.memory_space<vmem>>
    %12 = tpu.memref_squeeze %11 : memref<1x4x256xf32, #tpu.memory_space<vmem>> -> memref<4x256xf32, #tpu.memory_space<vmem>>
    %13 = tpu.memref_slice %arg9[%c0_i32_1] : memref<2x!tpu.dma_semaphore, #tpu.memory_space<semaphore_mem>> -> memref<1x!tpu.dma_semaphore, #tpu.memory_space<semaphore_mem>>
    %14 = tpu.memref_squeeze %13 : memref<1x!tpu.dma_semaphore, #tpu.memory_space<semaphore_mem>> -> memref<!tpu.dma_semaphore, #tpu.memory_space<semaphore_mem>>
    tpu.enqueue_dma source(%10 : memref<4x256xf32, #tpu.memory_space<any>>) target(%12 : memref<4x256xf32, #tpu.memory_space<vmem>>) target_semaphore(%14 : memref<!tpu.dma_semaphore, #tpu.memory_space<semaphore_mem>>)
    %cst = arith.constant 0.000000e+00 : f32
    %15 = vector.broadcast %cst : f32 to vector<4x512xf32>
    %c0 = arith.constant 0 : index
    %c0_6 = arith.constant 0 : index
    %16 = vector.load %arg10[%c0, %c0_6] : memref<4x512xf32, #tpu.memory_space<vmem>>, vector<4x512xf32>
    tpu.vector_store %arg10[%c0, %c0_6], %15 {strides = array<i32>} : memref<4x512xf32, #tpu.memory_space<vmem>>, vector<4x512xf32>,
    %c0_7 = arith.constant 0 : index
    %c0_8 = arith.constant 0 : index
    %c0_9 = arith.constant 0 : index
    %17 = vector.load %arg4[%c0_7, %c0_8, %c0_9] : memref<1x1x512xi32, #tpu.memory_space<vmem>>, vector<1x1x512xi32>
    %18 = vector.shape_cast %17 : vector<1x1x512xi32> to vector<1x512xi32>
    %c0_10 = arith.constant 0 : index
    %c0_11 = arith.constant 0 : index
    %c0_12 = arith.constant 0 : index
    %19 = vector.load %arg5[%c0_10, %c0_11, %c0_12] : memref<1x4x512xf32, #tpu.memory_space<vmem>>, vector<1x4x512xf32>
    %20 = vector.shape_cast %19 : vector<1x4x512xf32> to vector<4x512xf32>
    %21 = vector.extract_strided_slice %20 {offsets = [0, 0], sizes = [1, 512], strides = [1, 1]} : vector<4x512xf32> to vector<1x512xf32>
    %22 = vector.extract_strided_slice %20 {offsets = [1, 0], sizes = [1, 512], strides = [1, 1]} : vector<4x512xf32> to vector<1x512xf32>
    %23 = vector.extract_strided_slice %20 {offsets = [2, 0], sizes = [1, 512], strides = [1, 1]} : vector<4x512xf32> to vector<1x512xf32>
    %24 = vector.extract_strided_slice %20 {offsets = [3, 0], sizes = [1, 512], strides = [1, 1]} : vector<4x512xf32> to vector<1x512xf32>
    %25 = tpu.iota {dimensions = array<i32: 0>} : vector<256x512xi32>
    %c0_i32_13 = arith.constant 0 : i32
    %26 = arith.subi %5, %c0_i32_13 : i32
    %c1_i32 = arith.constant 1 : i32
    %c1_i32_14 = arith.constant 1 : i32
    %27 = arith.subi %c1_i32, %c1_i32_14 : i32
    %28 = arith.addi %26, %27 : i32
    %c1_i32_15 = arith.constant 1 : i32
    %29 = arith.divsi %28, %c1_i32_15 : i32
    %c1_i32_16 = arith.constant 1 : i32
    %c0_i32_17 = arith.constant 0 : i32
    %c0_i32_18 = arith.constant 0 : i32
    %30 = arith.subi %29, %c0_i32_18 : i32
    %31 = arith.addi %c0_i32_18, %30 : i32
    %c1_i32_19 = arith.constant 1 : i32
    scf.for %arg11 = %c0_i32_18 to %31 step %c1_i32_19  : i32 {
      %36 = arith.muli %arg11, %c1_i32_16 : i32
      %37 = arith.addi %c0_i32_17, %36 : i32
      %c1_i32_25 = arith.constant 1 : i32
      %38 = arith.andi %37, %c1_i32_25 : i32
      %c0_i32_26 = arith.constant 0 : i32
      %c0_i32_27 = arith.constant 0 : i32
      %c0_i32_28 = arith.constant 0 : i32
      %39 = tpu.memref_slice %arg6[%c0_i32_26, %c0_i32_27, %c0_i32_28] : memref<4x4x256xf32, #tpu.memory_space<any>> -> memref<1x4x256xf32, #tpu.memory_space<any>>
      %40 = tpu.memref_squeeze %39 : memref<1x4x256xf32, #tpu.memory_space<any>> -> memref<4x256xf32, #tpu.memory_space<any>>
      %c0_i32_29 = arith.constant 0 : i32
      %c0_i32_30 = arith.constant 0 : i32
      %41 = tpu.memref_slice %arg8[%38, %c0_i32_29, %c0_i32_30] : memref<2x4x256xf32, #tpu.memory_space<vmem>> -> memref<1x4x256xf32, #tpu.memory_space<vmem>>
      %42 = tpu.memref_squeeze %41 : memref<1x4x256xf32, #tpu.memory_space<vmem>> -> memref<4x256xf32, #tpu.memory_space<vmem>>
      %43 = tpu.memref_slice %arg9[%38] : memref<2x!tpu.dma_semaphore, #tpu.memory_space<semaphore_mem>> -> memref<1x!tpu.dma_semaphore, #tpu.memory_space<semaphore_mem>>
      %44 = tpu.memref_squeeze %43 : memref<1x!tpu.dma_semaphore, #tpu.memory_space<semaphore_mem>> -> memref<!tpu.dma_semaphore, #tpu.memory_space<semaphore_mem>>
      tpu.wait_dma2 semaphore(%44 : memref<!tpu.dma_semaphore, #tpu.memory_space<semaphore_mem>>) src(%40 : memref<4x256xf32, #tpu.memory_space<any>>) dst(%42 : memref<4x256xf32, #tpu.memory_space<vmem>>)
      %c1_i32_31 = arith.constant 1 : i32
      %45 = arith.addi %37, %c1_i32_31 : i32
      %46 = arith.cmpi slt, %45, %5 : i32
      %47 = arith.extui %46 : i1 to i32
      %c0_i32_32 = arith.constant 0 : i32
      %48 = arith.cmpi ne, %47, %c0_i32_32 : i32
      scf.if %48 {
        %c1_i32_42 = arith.constant 1 : i32
        %87 = arith.addi %37, %c1_i32_42 : i32
        %c1_i32_43 = arith.constant 1 : i32
        %88 = arith.subi %c1_i32_43, %38 : i32
        %89 = arith.addi %7, %87 : i32
        %c0_i32_44 = arith.constant 0 : i32
        %c0_i32_45 = arith.constant 0 : i32
        %90 = tpu.memref_slice %arg6[%89, %c0_i32_44, %c0_i32_45] : memref<4x4x256xf32, #tpu.memory_space<any>> -> memref<1x4x256xf32, #tpu.memory_space<any>>
        %91 = tpu.memref_squeeze %90 : memref<1x4x256xf32, #tpu.memory_space<any>> -> memref<4x256xf32, #tpu.memory_space<any>>
        %c0_i32_46 = arith.constant 0 : i32
        %c0_i32_47 = arith.constant 0 : i32
        %92 = tpu.memref_slice %arg8[%88, %c0_i32_46, %c0_i32_47] : memref<2x4x256xf32, #tpu.memory_space<vmem>> -> memref<1x4x256xf32, #tpu.memory_space<vmem>>
        %93 = tpu.memref_squeeze %92 : memref<1x4x256xf32, #tpu.memory_space<vmem>> -> memref<4x256xf32, #tpu.memory_space<vmem>>
        %94 = tpu.memref_slice %arg9[%88] : memref<2x!tpu.dma_semaphore, #tpu.memory_space<semaphore_mem>> -> memref<1x!tpu.dma_semaphore, #tpu.memory_space<semaphore_mem>>
        %95 = tpu.memref_squeeze %94 : memref<1x!tpu.dma_semaphore, #tpu.memory_space<semaphore_mem>> -> memref<!tpu.dma_semaphore, #tpu.memory_space<semaphore_mem>>
        tpu.enqueue_dma source(%91 : memref<4x256xf32, #tpu.memory_space<any>>) target(%93 : memref<4x256xf32, #tpu.memory_space<vmem>>) target_semaphore(%95 : memref<!tpu.dma_semaphore, #tpu.memory_space<semaphore_mem>>)
      } else {
      }
      %49 = arith.addi %2, %37 : i32
      %c256_i32 = arith.constant 256 : i32
      %50 = arith.muli %49, %c256_i32 : i32
      %51 = vector.broadcast %50 : i32 to vector<1x512xi32>
      %52 = arith.subi %18, %51 : vector<1x512xi32>
      %53 = vector.broadcast %52 : vector<1x512xi32> to vector<256x512xi32>
      %54 = arith.cmpi eq, %25, %53 : vector<256x512xi32>
      %c1_i32_33 = arith.constant 1 : i32
      %55 = vector.broadcast %c1_i32_33 : i32 to vector<1x512xi32>
      %56 = arith.addi %52, %55 : vector<1x512xi32>
      %57 = vector.broadcast %56 : vector<1x512xi32> to vector<256x512xi32>
      %58 = arith.cmpi eq, %25, %57 : vector<256x512xi32>
      %c32_i32 = arith.constant 32 : i32
      %59 = vector.broadcast %c32_i32 : i32 to vector<1x512xi32>
      %60 = arith.addi %52, %59 : vector<1x512xi32>
      %61 = vector.broadcast %60 : vector<1x512xi32> to vector<256x512xi32>
      %62 = arith.cmpi eq, %25, %61 : vector<256x512xi32>
      %c33_i32 = arith.constant 33 : i32
      %63 = vector.broadcast %c33_i32 : i32 to vector<1x512xi32>
      %64 = arith.addi %52, %63 : vector<1x512xi32>
      %65 = vector.broadcast %64 : vector<1x512xi32> to vector<256x512xi32>
      %66 = arith.cmpi eq, %25, %65 : vector<256x512xi32>
      %cst_34 = arith.constant 0.000000e+00 : f32
      %67 = vector.shape_cast %24 : vector<1x512xf32> to vector<1x512xf32>
      %68 = vector.broadcast %67 : vector<1x512xf32> to vector<256x512xf32>
      %69 = vector.broadcast %cst_34 : f32 to vector<256x512xf32>
      %70 = arith.select %66, %68, %69 : vector<256x512xi1>, vector<256x512xf32>
      %71 = vector.shape_cast %23 : vector<1x512xf32> to vector<1x512xf32>
      %72 = vector.broadcast %71 : vector<1x512xf32> to vector<256x512xf32>
      %73 = arith.select %62, %72, %70 : vector<256x512xi1>, vector<256x512xf32>
      %74 = vector.shape_cast %22 : vector<1x512xf32> to vector<1x512xf32>
      %75 = vector.broadcast %74 : vector<1x512xf32> to vector<256x512xf32>
      %76 = arith.select %58, %75, %73 : vector<256x512xi1>, vector<256x512xf32>
      %77 = vector.shape_cast %21 : vector<1x512xf32> to vector<1x512xf32>
      %78 = vector.broadcast %77 : vector<1x512xf32> to vector<256x512xf32>
      %79 = arith.select %54, %78, %76 : vector<256x512xi1>, vector<256x512xf32>
      %c0_35 = arith.constant 0 : index
      %c0_36 = arith.constant 0 : index
      %80 = vector.load %arg10[%c0_35, %c0_36] : memref<4x512xf32, #tpu.memory_space<vmem>>, vector<4x512xf32>
      %81 = arith.index_cast %38 : i32 to index
      %c0_37 = arith.constant 0 : index
      %c0_38 = arith.constant 0 : index
      %82 = vector.load %arg8[%81, %c0_37, %c0_38] : memref<2x4x256xf32, #tpu.memory_space<vmem>>, vector<1x4x256xf32>
      %83 = vector.shape_cast %82 : vector<1x4x256xf32> to vector<4x256xf32>
      %cst_39 = arith.constant dense<0.000000e+00> : vector<4x512xf32>
      %84 = tpu.matmul %83, %79, %cst_39 {dimension_numbers = #tpu.dot_dimension_numbers<[1], [0], [0], [1], [0, 0, 1, 1], [], []>} : vector<4x256xf32>, vector<256x512xf32>, vector<4x512xf32> -> vector<4x512xf32>
      %85 = arith.addf %80, %84 : vector<4x512xf32>
      %c0_40 = arith.constant 0 : index
      %c0_41 = arith.constant 0 : index
      %86 = vector.load %arg10[%c0_40, %c0_41] : memref<4x512xf32, #tpu.memory_space<vmem>>, vector<4x512xf32>
      tpu.vector_store %arg10[%c0_40, %c0_41], %85 {strides = array<i32>} : memref<4x512xf32, #tpu.memory_space<vmem>>, vector<4x512xf32>,
    }
    %c0_20 = arith.constant 0 : index
    %c0_21 = arith.constant 0 : index
    %32 = vector.load %arg10[%c0_20, %c0_21] : memref<4x512xf32, #tpu.memory_space<vmem>>, vector<4x512xf32>
    %c0_22 = arith.constant 0 : index
    %c0_23 = arith.constant 0 : index
    %c0_24 = arith.constant 0 : index
    %33 = vector.load %arg7[%c0_22, %c0_23, %c0_24] : memref<1x4x512xf32, #tpu.memory_space<vmem>>, vector<1x4x512xf32>
    %34 = vector.shape_cast %33 : vector<1x4x512xf32> to vector<4x512xf32>
    %35 = vector.shape_cast %32 : vector<4x512xf32> to vector<1x4x512xf32>
    tpu.vector_store %arg7[%c0_22, %c0_23, %c0_24], %35 {strides = array<i32>} : memref<1x4x512xf32, #tpu.memory_space<vmem>>, vector<1x4x512xf32>,
    return
  }
  func.func @transform_0(%arg0: i32, %arg1: i32, %arg2: memref<2x1xi32, #tpu.memory_space<smem>>, %arg3: memref<2x1xi32, #tpu.memory_space<smem>>) -> (i32, i32, i32) {
    %c0_i32 = arith.constant 0 : i32
    %c0_i32_0 = arith.constant 0 : i32
    return %arg0, %c0_i32, %arg1 : i32, i32, i32
  }
  func.func @transform_1(%arg0: i32, %arg1: i32, %arg2: memref<2x1xi32, #tpu.memory_space<smem>>, %arg3: memref<2x1xi32, #tpu.memory_space<smem>>) -> (i32, i32, i32) {
    %c0_i32 = arith.constant 0 : i32
    %c0_i32_0 = arith.constant 0 : i32
    return %arg0, %c0_i32, %arg1 : i32, i32, i32
  }
  func.func @transform_3(%arg0: i32, %arg1: i32, %arg2: memref<2x1xi32, #tpu.memory_space<smem>>, %arg3: memref<2x1xi32, #tpu.memory_space<smem>>) -> (i32, i32, i32) {
    %c0_i32 = arith.constant 0 : i32
    %c0_i32_0 = arith.constant 0 : i32
    return %arg0, %c0_i32, %arg1 : i32, i32, i32
  }
}

</mosaic_0001>

<bundles_post_ra>
// kernel: tpu_custom_call.1
= control target key start
LH: loop header
LB: loop body
LE: loop exit
PB: predicated region body
PF: predicated region fallthrough
CT: control target
= control target key end

     0   :  { %s4327_s0 = inlined_call_operand.vmem [shape: s32[2,1], index: 0, kind: input, shape index: {}]   ;;  %s4328_s2 = inlined_call_operand.vmem [shape: s32[2,1,512], index: 2, kind: input, shape index: {}]   ;;  %s4329_s3 = inlined_call_operand.hbm [shape: f32[2,4,512], index: 3, kind: input, shape index: {}]   ;;  %s4330_s4 = inlined_call_operand.hbm [shape: f32[4,4,256], index: 4, kind: input, shape index: {}]   ;;  %s4331_s5 = inlined_call_operand.hbm [shape: f32[2,4,512], index: 5, kind: output, shape index: {}]   ;;  %s4332_s1 = inlined_call_operand.vmem [shape: s32[2,1], index: 1, kind: input, shape index: {}]  }
   0x1   :  { %4356 = sst [smem:[#allocation37_spill]] %s4328_s2  ;;  %s10_s20 = sshll.u32 %s4327_s0, 4  ;;  %s11_s20 = int_to_ptr.vmem [resolvable:$true] %s10_s20 }
   0x2   :  { %4357 = sst [smem:[#allocation38_spill]] %s4329_s3  ;;  %s14_s23 = sshll.u32 %s4332_s1, 4  ;;  %s15_s23 = int_to_ptr.vmem [resolvable:$true] %s14_s23 }
   0x3   :  { %s1998_s24 = scalar_lea.vmem %s11_s20, 32  ;;  %p2003_p1 = scmp.lt.s32.totalorder %s11_s20, %s11_s20 }
   0x4   :  { %p1999_p0 = scmp.ne.s32.totalorder %s11_s20, %s1998_s24  ;;  %p2004_p2 = scmp.lt.s32.totalorder %s1998_s24, %s1998_s24 }
   0x6   :  { %p2005_p3 = por %p2004_p2, %p2003_p1 }
   0x8   :  { %p2006_p4 = pnand %p2005_p3, %p1999_p0 }
   0xa   :  { %2009 = shalt.err (!%p2006_p4)  }
   0xb   :  { %s2193_s25 = smov [#allocation6]   ;;  %s2010_s26 = scalar_lea.vmem %s15_s23, 32 }
   0xc   :  { %13 = dma.vmem_to_smem %s11_s20, 32, %s2193_s25, [#allocation5] }
   0xd   :  { %p2011_p5 = scmp.ne.s32.totalorder %s15_s23, %s2010_s26  ;;  %p2015_p6 = scmp.lt.s32.totalorder %s15_s23, %s15_s23 }
   0xe   :  { %p2016_p7 = scmp.lt.s32.totalorder %s2010_s26, %s2010_s26 }
  0x10   :  { %p2017_p8 = por %p2016_p7, %p2015_p6 }
  0x12   :  { %p2018_p9 = pnand %p2017_p8, %p2011_p5 }
  0x14   :  { %2021 = shalt.err (!%p2018_p9)  }
  0x15   :  { %s2194_s0 = smov [#allocation7]  }
  0x16   :  { %17 = dma.vmem_to_smem %s15_s23, 32, %s2194_s0, [#allocation5] }
  0x17   :  { %2153 = dma.done.wait [#allocation5], 64 }
  0x18   :  { %2154 = vsyncadd [#allocation5], 4294967232 }
  0x19   :  { %19 = sfence }
  0x1a   :  { %20 = vsyncpa [#allocation9], 0 }
  0x1b   :  { %22 = vsyncpa [#allocation9 + $0x1], 0 }
  0x1c   :  { %23 = vsyncpa [#allocation10], 0 }
  0x1d   :  { %25 = vsyncpa [#allocation10 + $0x1], 0  ;;  %s2235_s1 = smov 0   ;;  %s2237_s27 = smov 0  }
  0x1e   :  { %s2239_s28 = smov 0   ;;  %s2241_s29 = smov 0  }
  0x1f   :  { %s2243_s30 = smov 0   ;;  %s2245_s6 = smov 0  }
  0x20 LB: > { %s1884_s7 = sadd.s32 4294967295, %s2187_s6   ;;  %s1885_s8 = sadd.s32 4294967294, %s2187_s6   ;;  %s2187_s6 = sphi %s2245_s6, %s31_s6   ;;  %s2183_s30 = sphi %s2243_s30, %s4405_s30   ;;  %s2179_s29 = sphi %s2241_s29, %s4404_s29   ;;  %s2175_s28 = sphi %s2239_s28, %s4403_s28   ;;  %s2171_s27 = sphi %s2237_s27, %s4402_s27   ;;  %s2167_s1 = sphi %s2235_s1, %s4401_s1  }
  0x21   : > { %s43_s9 = sadd.s32 1, %s2183_s30  ;;  %s80_s10 = sadd.s32 1, %s2175_s28 }
  0x22   : > { %p45_p10 = scmp.ge.s32.totalorder %s43_s9, 2  ;;  %p87_p11 = scmp.ne.s32.totalorder %s2175_s28, %s2171_s27 }
  0x23   : > { %p88_p12 = scmp.eq.s32.totalorder %s2187_s6, 0  ;;  %p93_p13 = scmp.ne.s32.totalorder %s2171_s27, %s2167_s1 }
  0x24   : > { %s4407_s9 = smov (%p45_p10, %s43_s9), 0  ;;  %p94_p1 = scmp.eq.s32.totalorder %s1884_s7, 0 }
  0x25   : > { %p2276_p0 = por %p88_p12, %p87_p11  ;;  %s75_s12 = ssub.s32 %s2183_s30, %s4407_s9 }
  0x26   : > { %p119_p2 = scmp.eq.s32.totalorder %s1884_s7, 1  ;;  %p78_p3 = scmp.eq.s32.totalorder %s75_s12, 0 }
  0x27   : > { %p2282_p4 = por %p94_p1, %p93_p13  ;;  %p125_p6 = scmp.eq.s32.totalorder %s1885_s8, 1 }
  0x28   : > { %p2286_p5 = por %p119_p2, %p87_p11  ;;  %p1934_p9 = scmp.lt.s32.totalorder %s2187_s6, 2 }
  0x29   : > { %s2291_s15 = scalar_select %p78_p3, %s2175_s28, %s80_s10  }
  0x2a   : > { %p2293_p7 = por %p125_p6, %p93_p13  ;;  %s157_s17 = sand.u32 1, %s2175_s28  }
  0x2b   : > { %s1888_s18 = sshll.u32 %s157_s17, 4  ;;  %s1915_s19 = sshll.u32 %s2183_s30, 8 }
  0x2c   : > { %s4361_s16 = scalar_select %p2293_p7, 1, 0 }
  0x2d   : > { %s4362_s3 = sld [smem:[#allocation38_spill]]  ;;  %s161_s23 = scalar_lea.vmem [#allocation8], %s1888_s18 }
  0x2e   : > { %s171_s24 = sshll.u32 %s161_s23, 4  ;;  %p2306_p10 = pnand %p1934_p9, %p2276_p0  ;;  %s172_s24 = int_to_ptr.vmem [resolvable:$true] %s171_s24 }
  0x2f   : > { %p1891_p11 = scmp.ge.s32.totalorder %s2187_s6, 1  ;;  %p176_p12 = scmp.lt.s32.totalorder %s2187_s6, 3 }
  0x30   : > { %s158_s26 = scalar_lea.sflag [#allocation9], %s157_s17  ;;  %p2024_p13 = pneg %p2306_p10 }
  0x31   : > { %s2035_s0 = scalar_lea.vmem %s172_s24, 256  ;;  %s2195_s7 = smov [#allocation8]  }
  0x32   : > { %p2036_p1 = scmp.ne.s32.totalorder %s172_s24, %s2035_s0  ;;  %s2040_s8 = sshll.u32 %s2195_s7, 4  ;;  %s2041_s8 = int_to_ptr.vmem [resolvable:$false] %s2040_s8 }
  0x33   : > { %s169_s22 = scalar_lea.hbm %s4362_s3, %s1915_s19  ;;  %s2042_s10 = scalar_lea.vmem %s2041_s8, 512 }
  0x34   : > { %p2038_p2 = pnand %p2036_p1, %p2024_p13  ;;  %p2043_p6 = scmp.lt.s32.totalorder %s172_s24, %s2041_s8 }
  0x35   : > { %p2044_p8 = scmp.lt.s32.totalorder %s2042_s10, %s2035_s0 }
  0x36   : > { %p2039_p3 = pneg %p2038_p2 }
  0x37   : > { %p2045_p0 = por %p2044_p8, %p2043_p6 }
  0x39   : > { %p2046_p9 = pnand %p2045_p0, %p2039_p3 }
  0x3b   : > { %2049 = shalt.err (!%p2046_p9)
}
  0x3c   : > { %1929 = dma.hbm_to_vmem [thread:$0]  (!%p2306_p10), %s169_s22, 256, %s172_s24, %s158_s26  }
  0x3d   : > { %p177_p7 = pnand %p1891_p11, %p176_p12 }
  0x3f   : > { %180 = sbr.rel (%p177_p7) target bundleno = 625 (0x271), region = 28 }
  0x44   : > { %s2321_s11 = sand.u32 1, %s2171_s27  }
  0x45   : > { %s1892_s12 = sshll.u32 %s2321_s11, 4  ;;  %s183_s17 = scalar_lea.sflag [#allocation9], %s2321_s11 }
  0x46   : > { %s2327_s18 = scalar_lea.vmem [#allocation8], %s1892_s12 }
  0x47   : > { %2156 = dma.done.wait (%p2282_p4), %s183_s17, 256  }
  0x48   : > { %2158 = vsyncadd (%p2282_p4), %s183_s17, 4294967040  ;;  %p216_p7 = scmp.lt.s32.totalorder %s2179_s29, 1  ;;  %v256_v0 = vlaneseq  ;;  %s1895_s19 = sshll.u32 %s2179_s29, 7  ;;  %v2196_v1 = vmov 0.0   ;;  %v2385_v16 = vld [vmem:[%s2327_s18] sm:$0xff]  ;;  %v2388_v17 = vld [vmem:[%s2327_s18 + $0x8] sm:$0xff] }
  0x49   : > { %251 = vst [vmem:[#allocation4] sm:$0xff] %v2196_v1  ;;  %252 = vst [vmem:[#allocation4 + $0x8] sm:$0xff] %v2196_v1  ;;  %s2338_s21 = sld [smem:[#allocation6 + %s1895_s19]]  ;;  %s1896_s26 = sshll.u32 %s2179_s29, 1 }
  0x4a   : > { %s217_s20 = scalar_select %p216_p7, %s2179_s29, 1  ;;  %v2336_v2 = vshrl.u32 %v256_v0, 7 }
  0x4b   : > { %s2340_s23 = sld [smem:[#allocation7 + %s1895_s19]]  ;;  %s2197_s0 = smov [#allocation2]  }
  0x4c   : > { %4364 = vst [vmem:[#allocation22_spill] sm:$0xff] %v2336_v2  ;;  %s1894_s22 = sshll.u32 %s217_s20, 2  ;;  %v2343_v3 = vadd.s32 8, %v2336_v2  ;;  %v2346_v4 = vadd.s32 16, %v2336_v2  ;;  %v2349_v5 = vadd.s32 24, %v2336_v2  ;;  %v2352_v6 = vadd.s32 32, %v2336_v2 }
  0x4d   : > { %s4367_s2 = sld [smem:[#allocation37_spill]]  ;;  %v2358_v7 = vadd.s32 40, %v2336_v2  ;;  %v2361_v8 = vadd.s32 48, %v2336_v2  ;;  %v2364_v9 = vadd.s32 56, %v2336_v2  ;;  %v2367_v10 = vadd.s32 64, %v2336_v2  ;;  %s247_s7 = sshll.u32 %s2197_s0, 4  ;;  %s2411_s7 = int_to_ptr.vmem [resolvable:$true] %s247_s7 }
  0x4e   : > { %4366 = vst [vmem:[#allocation24_spill] sm:$0xff] %v2343_v3  ;;  %v2371_v11 = vadd.s32 72, %v2336_v2  ;;  %v2374_v12 = vadd.s32 80, %v2336_v2  ;;  %v2377_v13 = vadd.s32 88, %v2336_v2  ;;  %v2380_v14 = vadd.s32 96, %v2336_v2  ;;  %s4344_s24 = scalar_lea.hbm %s4330_s4, 512 }
  0x4f   : > { %4365 = sst [smem:[#allocation23_spill]] %s2338_s21  ;;  %v2391_v18 = vadd.s32 104, %v2336_v2  ;;  %v2394_v19 = vadd.s32 112, %v2336_v2  ;;  %v2397_v20 = vadd.s32 120, %v2336_v2  ;;  %v2400_v21 = vadd.s32 128, %v2336_v2  ;;  %s2409_s8 = sadd.s32 %s1896_s26, %s2338_s21 }
  0x50   : > { %v2403_v22 = vadd.s32 136, %v2336_v2  ;;  %v2406_v23 = vadd.s32 144, %v2336_v2  ;;  %4372 = sst [smem:[#allocation29_spill]] %s2409_s8  ;;  %v2414_v24 = vadd.s32 152, %v2336_v2  ;;  %v2417_v25 = vadd.s32 160, %v2336_v2  ;;  %s1916_s10 = sshll.u32 %s2409_s8, 7 }
  0x51   : > { %4369 = vst [vmem:[#allocation26_spill] sm:$0xff] %v2400_v21  ;;  %v2420_v26 = vadd.s32 168, %v2336_v2  ;;  %v2423_v27 = vadd.s32 176, %v2336_v2  ;;  %v2427_v28 = vadd.s32 184, %v2336_v2  ;;  %v2430_v29 = vadd.s32 192, %v2336_v2  ;;  %s239_s19 = scalar_lea.hbm %s4330_s4, %s1916_s10 }
  0x52   : > { %4370 = vst [vmem:[#allocation27_spill] sm:$0xff] %v2403_v22  ;;  %4371 = vst [vmem:[#allocation28_spill] sm:$0xff] %v2406_v23  ;;  %v2433_v30 = vadd.s32 200, %v2336_v2  ;;  %v2436_v31 = vadd.s32 208, %v2336_v2  ;;  %v2442_v32 = vadd.s32 216, %v2336_v2  ;;  %v2445_v33 = vadd.s32 224, %v2336_v2  ;;  %p2053_p8 = scmp.lt.s32.totalorder %s239_s19, %s4330_s4 }
  0x53   : > { %s222_s25 = scalar_lea.vmem %s4367_s2, %s1894_s22  ;;  %4373 = vst [vmem:[#allocation30_spill] sm:$0xff] %v2414_v24  ;;  %4374 = vst [vmem:[#allocation31_spill] sm:$0xff] %v2417_v25  ;;  %v2448_v34 = vadd.s32 232, %v2336_v2  ;;  %v2451_v35 = vadd.s32 240, %v2336_v2  ;;  %s2050_s20 = scalar_lea.hbm %s239_s19, 128 }
  0x54   : > { %v2382_v15 = vld [vmem:[%s222_s25] sm:$0xf]  ;;  %4375 = vst [vmem:[#allocation32_spill] sm:$0xff] %v2420_v26  ;;  %4376 = vst [vmem:[#allocation33_spill] sm:$0xff] %v2423_v27  ;;  %p2051_p4 = scmp.ne.s32.totalorder %s239_s19, %s2050_s20  ;;  %p2054_p10 = scmp.lt.s32.totalorder %s4344_s24, %s2050_s20 }
  0x55   : > { %4368 = vst [vmem:[#allocation25_spill] sm:$0xff] %v2382_v15  ;;  %4377 = vst [vmem:[#allocation34_spill] sm:$0xff] %v2427_v28 }
  0x56   : > { %4378 = vst [vmem:[#allocation35_spill] sm:$0xff] %v2430_v29  ;;  %4379 = vst [vmem:[#allocation36_spill] sm:$0xff] %v2433_v30  ;;  %p2055_p11 = por %p2054_p10, %p2053_p8 }
  0x58   : > { %p2056_p12 = pnand %p2055_p11, %p2051_p4 }
  0x5a   : > { %2059 = shalt.err (!%p2056_p12)  }
  0x5b   : > { %s2060_s17 = scalar_lea.vmem %s2411_s7, 128  ;;  %s4343_s18 = scalar_lea.vmem %s2411_s7, 256 }
  0x5c   : > { %p2061_p13 = scmp.ne.s32.totalorder %s2411_s7, %s2060_s17  ;;  %p2065_p1 = scmp.lt.s32.totalorder %s2411_s7, %s2411_s7 }
  0x5d   : > { %p2066_p2 = scmp.lt.s32.totalorder %s4343_s18, %s2060_s17 }
  0x5f   : > { %p2067_p3 = por %p2066_p2, %p2065_p1 }
  0x61   : > { %p2068_p6 = pnand %p2067_p3, %p2061_p13 }
  0x63   : > { %2071 = shalt.err (!%p2068_p6)  }
  0x64   : > { %250 = dma.hbm_to_vmem [thread:$0]  %s239_s19, 128, %s2411_s7, [#allocation3]  ;;  %v2472_v36 = vadd.s32 248, %v2336_v2 }
  0x65   : > { %s2476_s20 = scalar_lea.vmem [#allocation11], %s1892_s12  ;;  %p1899_p0 = scmp.le.s32.totalorder %s2340_s23, 0 }
  0x66   : > { %s2479_s22 = smov (!%p1899_p0), 0  }
  0x67   : > { %1843 = sbr.rel (%p1899_p0) target bundleno = 602 (0x25a), region = 96 }
  0x6c LB: >> { %v4380_v3 = vld [vmem:[#allocation24_spill] sm:$0xff]  ;;  %v4381_v2 = vld [vmem:[#allocation22_spill] sm:$0xff]  ;;  %s4382_s21 = sld [smem:[#allocation23_spill]]  ;;  %s2485_s19 = sand.u32 1, %s2191_s22  ;;  %s2191_s22 = sphi %s2479_s22, %s3176_s22  }
  0x6d   : >> { %s1917_s13 = sshll.u32 %s2485_s19, 3  ;;  %s299_s25 = scalar_lea.sflag [#allocation3], %s2485_s19  ;;  %v2494_v37 = vsub.s32 0, %v4381_v2  ;;  %v2497_v38 = vsub.s32 1, %v4381_v2  ;;  %v2500_v39 = vsub.s32 2, %v4381_v2  ;;  %v2503_v40 = vsub.s32 3, %v4381_v2 }
  0x6e   : >> { %s2488_s12 = scalar_lea.vmem [#allocation2], %s1917_s13 }
  0x72   : >> { %s329_s26 = sadd.s32 %s2191_s22, %s4382_s21 }
  0x73   : >> { %2159 = dma.done.wait %s299_s25, 128 }
  0x74   : >> { %2160 = vsyncadd %s299_s25, 4294967168  ;;  %s1907_s0 = sshll.u32 %s329_s26, 8  ;;  %v920_v41 = vsub.s32 7, %v4381_v2  ;;  %v1084_v42 = vsub.s32 6, %v4381_v2  ;;  %v1248_v43 = vsub.s32 5, %v4381_v2  ;;  %v1412_v44 = vsub.s32 4, %v4381_v2 }
  0x75   : >> { %v331_v45 = vstv %s1907_s0  ;;  %v917_v46 = vrot.slane %v2385_v16, %v2503_v40  ;;  %v1081_v47 = vrot.slane %v2385_v16, %v2500_v39  ;;  %v1245_v48 = vrot.slane %v2385_v16, %v2497_v38  ;;  %v4383_v15 = vld [vmem:[#allocation25_spill] sm:$0xff]  ;;  %s4384_s8 = sld [smem:[#allocation29_spill]]  ;;  %s309_s10 = ssub.s32 1, %s2485_s19 }
  0x76   : >> { %v332_v49 = vsub.s32 %v4383_v15, %v331_v45  ;;  %v921_v50 = vrot.slane %v2385_v16, %v920_v41  ;;  %v1085_v51 = vrot.slane %v2385_v16, %v1084_v42  ;;  %v1249_v52 = vrot.slane %v2385_v16, %v1248_v43  ;;  %s3164_s13 = sshll.u32 %s309_s10, 3 }
  0x77   : >> { %v1413_v53 = vrot.slane %v2385_v16, %v1412_v44  ;;  %v929_v54 = vrot.slane %v2388_v17, %v920_v41  ;;  %v1093_v55 = vrot.slane %v2388_v17, %v1084_v42  ;;  %v1257_v56 = vrot.slane %v2388_v17, %v1248_v43 }
  0x78   : >> { %v2524_v57 = vrot.slane %v332_v49, %v2497_v38  ;;  %v477_v58 = vadd.s32 1, %v332_v49  ;;  %v622_v59 = vadd.s32 32, %v332_v49  ;;  %v767_v60 = vadd.s32 33, %v332_v49 }
  0x79   : >> { %v2527_v61 = vrot.slane %v921_v50, %v2503_v40  ;;  %v2530_v62 = vrot.slane %v1085_v51, %v2500_v39  ;;  %v2533_v63 = vrot.slane %v1249_v52, %v2497_v38  ;;  %v2536_v0 = vrot.slane %v1413_v53, %v2494_v37 }
  0x7a   : >> { %vm410_vm0 = vcmp.eq.s32.totalorder %v2397_v20, %v2524_v57  ;;  %v2541_v1 = vrot.slane %v477_v58, %v2497_v38  ;;  %v2544_v41 = vrot.slane %v622_v59, %v2497_v38  ;;  %v2547_v42 = vrot.slane %v767_v60, %v2497_v38 }
  0x7b   : >> { %v2550_v43 = vrot.slane %v332_v49, %v2503_v40  ;;  %v2553_v45 = vrot.slane %v477_v58, %v2503_v40  ;;  %v2556_v50 = vrot.slane %v622_v59, %v2503_v40  ;;  %v2559_v51 = vrot.slane %v767_v60, %v2503_v40  ;;  %s1823_s17 = sadd.s32 %s2191_s22, %s4384_s8  ;;  %s3176_s22 = sadd.s32 1, %s2191_s22  }
  0x7c   : >> { %vm555_vm1 = vcmp.eq.s32.totalorder %v2397_v20, %v2541_v1  ;;  %vm700_vm2 = vcmp.eq.s32.totalorder %v2397_v20, %v2544_v41  ;;  %vm845_vm3 = vcmp.eq.s32.totalorder %v2397_v20, %v2547_v42  ;;  %v2568_v52 = vrot.slane %v929_v54, %v2503_v40  ;;  %s1904_s25 = sshll.u32 %s1823_s17, 7  ;;  %p1935_p9 = scmp.lt.s32.totalorder %s3176_s22, %s2340_s23 }
  0x7d   : >> { %v1011_v53 = vsel %vm845_vm3, %v2527_v61, 0.0  ;;  %vm412_vm4 = vcmp.eq.s32.totalorder %v2397_v20, %v2550_v43  ;;  %vm557_vm5 = vcmp.eq.s32.totalorder %v2397_v20, %v2553_v45  ;;  %vm702_vm6 = vcmp.eq.s32.totalorder %v2397_v20, %v2556_v50  ;;  %s3192_s18 = scalar_lea.hbm %s4330_s4, %s1904_s25  ;;  %s316_s25 = scalar_lea.vmem [#allocation2], %s3164_s13 }
  0x7e   : >> { %v1175_v15 = vsel %vm700_vm2, %v2530_v62, %v1011_v53  ;;  %vm847_vm7 = vcmp.eq.s32.totalorder %v2397_v20, %v2559_v51  ;;  %v2581_v21 = vrot.slane %v1093_v55, %v2500_v39  ;;  %v2584_v54 = vrot.slane %v1257_v56, %v2497_v38  ;;  %s3206_s17 = scalar_lea.hbm %s3192_s18, 128  ;;  %s325_s26 = sshll.u32 %s316_s25, 4  ;;  %s326_s26 = int_to_ptr.vmem [resolvable:$true] %s325_s26 }
  0x7f   : >> { %v1339_v22 = vsel %vm555_vm1, %v2533_v63, %v1175_v15  ;;  %v1013_v23 = vsel %vm847_vm7, %v2568_v52, 0.0  ;;  %v1421_v24 = vrot.slane %v2388_v17, %v1412_v44  ;;  %v2590_v25 = vrot.slane %v332_v49, %v2494_v37  ;;  %s317_s13 = scalar_lea.sflag [#allocation3], %s309_s10  ;;  %s2098_s0 = scalar_lea.hbm %s3192_s18, 256 }
  0x80   : >> { %v1503_v53 = vsel %vm410_vm0, %v2536_v0, %v1339_v22  ;;  %v1177_v55 = vsel %vm702_vm6, %v2581_v21, %v1013_v23  ;;  %v2598_v26 = vrot.slane %v477_v58, %v2494_v37  ;;  %v2601_v56 = vrot.slane %v622_v59, %v2494_v37  ;;  %p2073_p4 = scmp.ne.s32.totalorder %s3206_s17, %s2098_s0  ;;  %p2077_p11 = scmp.lt.s32.totalorder %s3206_s17, %s4330_s4 }
  0x81   : >> { %1576 = vmatprep.subr.mxu0 %v1503_v53  ;;  %v1341_v15 = vsel %vm557_vm5, %v2584_v54, %v1177_v55  ;;  %v2605_v44 = vrot.slane %v1421_v24, %v2494_v37  ;;  %vm409_vm8 = vcmp.eq.s32.totalorder %v2397_v20, %v2590_v25  ;;  %v2610_v27 = vrot.slane %v767_v60, %v2494_v37  ;;  %s4385_s8 = scalar_lea.hbm %s4330_s4, 512 }
  0x82   : >> { %vm554_vm9 = vcmp.eq.s32.totalorder %v2397_v20, %v2598_v26  ;;  %vm699_vm10 = vcmp.eq.s32.totalorder %v2397_v20, %v2601_v56  ;;  %v2617_v22 = vrot.slane %v917_v46, %v2503_v40  ;;  %v2620_v23 = vrot.slane %v1081_v47, %v2500_v39  ;;  %p2074_p8 = pnand %p2073_p4, %p1935_p9  ;;  %p2078_p12 = scmp.lt.s32.totalorder %s4385_s8, %s2098_s0 }
  0x83   : >> { %v1505_v24 = vsel %vm412_vm4, %v2605_v44, %v1341_v15  ;;  %vm844_vm11 = vcmp.eq.s32.totalorder %v2397_v20, %v2610_v27  ;;  %v2629_v53 = vrot.slane %v1245_v48, %v2497_v38  ;;  %v1409_v55 = vrot.slane %v2385_v16, %v2494_v37 }
  0x84   : >> { %1647 = vmatprep.subr.mxu1 %v1505_v24  ;;  %v1010_v46 = vsel %vm844_vm11, %v2617_v22, 0.0  ;;  %v2635_v47 = vrot.slane %v332_v49, %v2500_v39  ;;  %v2638_v28 = vrot.slane %v477_v58, %v2500_v39  ;;  %v2641_v15 = vrot.slane %v622_v59, %v2500_v39  ;;  %p2075_p10 = pneg %p2074_p8  ;;  %p2079_p13 = por %p2078_p12, %p2077_p11 }
  0x85   : >> { %v1174_v29 = vsel %vm699_vm10, %v2620_v23, %v1010_v46  ;;  %v2645_v48 = vrot.slane %v1409_v55, %v2494_v37  ;;  %v2648_v30 = vrot.slane %v767_v60, %v2500_v39  ;;  %v925_v24 = vrot.slane %v2388_v17, %v2503_v40 }
  0x86   : >> { %v1338_v49 = vsel %vm554_vm9, %v2629_v53, %v1174_v29  ;;  %vm411_vm12 = vcmp.eq.s32.totalorder %v2397_v20, %v2635_v47  ;;  %vm556_vm13 = vcmp.eq.s32.totalorder %v2397_v20, %v2638_v28  ;;  %v1089_v29 = vrot.slane %v2388_v17, %v2500_v39  ;;  %p2080_p1 = pnand %p2079_p13, %p2075_p10 }
  0x87   : >> { %v1502_v58 = vsel %vm409_vm8, %v2645_v48, %v1338_v49  ;;  %vm846_vm14 = vcmp.eq.s32.totalorder %v2397_v20, %v2648_v30  ;;  %v2667_v59 = vrot.slane %v925_v24, %v2503_v40  ;;  %vm701_vm15 = vcmp.eq.s32.totalorder %v2397_v20, %v2641_v15 }
  0x88   : >> { %1577 = vmatpush1.msra.mxu0 %v1502_v58  ;;  %v1253_v60 = vrot.slane %v2388_v17, %v2497_v38  ;;  %v1417_v55 = vrot.slane %v2388_v17, %v2494_v37  ;;  %vm551_vm0 = vcmp.eq.s32.totalorder %v2394_v19, %v2541_v1  ;;  %v2681_v40 = vrot.slane %v1089_v29, %v2500_v39 }
  0x89   : >> { %v1012_v46 = vsel %vm846_vm14, %v2667_v59, 0.0  ;;  %vm696_vm1 = vcmp.eq.s32.totalorder %v2394_v19, %v2544_v41  ;;  %vm841_vm2 = vcmp.eq.s32.totalorder %v2394_v19, %v2547_v42  ;;  %vm406_vm3 = vcmp.eq.s32.totalorder %v2394_v19, %v2524_v57 }
  0x8a   : >> { %v2688_v24 = vrot.slane %v1253_v60, %v2497_v38  ;;  %v2691_v49 = vrot.slane %v1417_v55, %v2494_v37  ;;  %v1007_v58 = vsel %vm841_vm2, %v2527_v61, 0.0  ;;  %v1176_v39 = vsel %vm701_vm15, %v2681_v40, %v1012_v46 }
  0x8b   : >> { %v1171_v29 = vsel %vm696_vm1, %v2530_v62, %v1007_v58  ;;  %vm408_vm4 = vcmp.eq.s32.totalorder %v2394_v19, %v2550_v43  ;;  %vm698_vm5 = vcmp.eq.s32.totalorder %v2394_v19, %v2556_v50  ;;  %vm553_vm6 = vcmp.eq.s32.totalorder %v2394_v19, %v2553_v45 }
  0x8c   : >> { %v1340_v37 = vsel %vm556_vm13, %v2688_v24, %v1176_v39  ;;  %v1335_v38 = vsel %vm551_vm0, %v2533_v63, %v1171_v29  ;;  %vm843_vm7 = vcmp.eq.s32.totalorder %v2394_v19, %v2559_v51  ;;  %vm550_vm8 = vcmp.eq.s32.totalorder %v2394_v19, %v2598_v26 }
  0x8d   : >> { %v1504_v60 = vsel %vm411_vm12, %v2691_v49, %v1340_v37  ;;  %v1499_v55 = vsel %vm406_vm3, %v2536_v0, %v1335_v38  ;;  %v1009_v46 = vsel %vm843_vm7, %v2568_v52, 0.0  ;;  %vm695_vm9 = vcmp.eq.s32.totalorder %v2394_v19, %v2601_v56 }
  0x8e   : >> { %1648 = vmatpush1.msra.mxu1 %v1504_v60  ;;  %1578 = vmatprep.subr.mxu0 %v1499_v55  ;;  %v1173_v58 = vsel %vm698_vm5, %v2581_v21, %v1009_v46  ;;  %vm840_vm10 = vcmp.eq.s32.totalorder %v2394_v19, %v2610_v27  ;;  %vm405_vm11 = vcmp.eq.s32.totalorder %v2394_v19, %v2590_v25 }
  0x8f   : >> { %v1337_v39 = vsel %vm553_vm6, %v2584_v54, %v1173_v58  ;;  %v1006_v29 = vsel %vm840_vm10, %v2617_v22, 0.0  ;;  %vm552_vm12 = vcmp.eq.s32.totalorder %v2394_v19, %v2638_v28  ;;  %vm697_vm13 = vcmp.eq.s32.totalorder %v2394_v19, %v2641_v15 }
  0x90   : >> { %v1501_v37 = vsel %vm408_vm4, %v2605_v44, %v1337_v39  ;;  %v1170_v38 = vsel %vm695_vm9, %v2620_v23, %v1006_v29  ;;  %vm842_vm14 = vcmp.eq.s32.totalorder %v2394_v19, %v2648_v30  ;;  %vm407_vm15 = vcmp.eq.s32.totalorder %v2394_v19, %v2635_v47 }
  0x91   : >> { %1649 = vmatprep.subr.mxu1 %v1501_v37  ;;  %v1334_v60 = vsel %vm550_vm8, %v2629_v53, %v1170_v38  ;;  %v1008_v55 = vsel %vm842_vm14, %v2667_v59, 0.0  ;;  %vm547_vm0 = vcmp.eq.s32.totalorder %v2391_v18, %v2541_v1  ;;  %vm692_vm1 = vcmp.eq.s32.totalorder %v2391_v18, %v2544_v41 }
  0x92   : >> { %v1498_v46 = vsel %vm405_vm11, %v2645_v48, %v1334_v60  ;;  %v1172_v58 = vsel %vm697_vm13, %v2681_v40, %v1008_v55  ;;  %vm837_vm2 = vcmp.eq.s32.totalorder %v2391_v18, %v2547_v42  ;;  %vm402_vm3 = vcmp.eq.s32.totalorder %v2391_v18, %v2524_v57 }
  0x93   : >> { %1579 = vmatpush1.msra.mxu0 %v1498_v46  ;;  %v1336_v39 = vsel %vm552_vm12, %v2688_v24, %v1172_v58  ;;  %v1003_v29 = vsel %vm837_vm2, %v2527_v61, 0.0  ;;  %vm549_vm4 = vcmp.eq.s32.totalorder %v2391_v18, %v2553_v45  ;;  %vm694_vm5 = vcmp.eq.s32.totalorder %v2391_v18, %v2556_v50 }
  0x94   : >> { %v1500_v37 = vsel %vm407_vm15, %v2691_v49, %v1336_v39  ;;  %v1167_v38 = vsel %vm692_vm1, %v2530_v62, %v1003_v29  ;;  %vm839_vm6 = vcmp.eq.s32.totalorder %v2391_v18, %v2559_v51  ;;  %vm404_vm7 = vcmp.eq.s32.totalorder %v2391_v18, %v2550_v43 }
  0x95   : >> { %1650 = vmatpush1.msra.mxu1 %v1500_v37  ;;  %v1331_v60 = vsel %vm547_vm0, %v2533_v63, %v1167_v38  ;;  %v1005_v55 = vsel %vm839_vm6, %v2568_v52, 0.0  ;;  %vm546_vm8 = vcmp.eq.s32.totalorder %v2391_v18, %v2598_v26  ;;  %vm691_vm9 = vcmp.eq.s32.totalorder %v2391_v18, %v2601_v56 }
  0x96   : >> { %v1495_v46 = vsel %vm402_vm3, %v2536_v0, %v1331_v60  ;;  %v1169_v58 = vsel %vm694_vm5, %v2581_v21, %v1005_v55  ;;  %vm836_vm10 = vcmp.eq.s32.totalorder %v2391_v18, %v2610_v27  ;;  %vm401_vm11 = vcmp.eq.s32.totalorder %v2391_v18, %v2590_v25 }
  0x97   : >> { %1580 = vmatprep.subr.mxu0 %v1495_v46  ;;  %v1333_v39 = vsel %vm549_vm4, %v2584_v54, %v1169_v58  ;;  %v1002_v29 = vsel %vm836_vm10, %v2617_v22, 0.0  ;;  %vm548_vm12 = vcmp.eq.s32.totalorder %v2391_v18, %v2638_v28  ;;  %vm693_vm13 = vcmp.eq.s32.totalorder %v2391_v18, %v2641_v15 }
  0x98   : >> { %v1497_v37 = vsel %vm404_vm7, %v2605_v44, %v1333_v39  ;;  %v1166_v38 = vsel %vm691_vm9, %v2620_v23, %v1002_v29  ;;  %vm838_vm14 = vcmp.eq.s32.totalorder %v2391_v18, %v2648_v30  ;;  %vm403_vm15 = vcmp.eq.s32.totalorder %v2391_v18, %v2635_v47 }
  0x99   : >> { %1651 = vmatprep.subr.mxu1 %v1497_v37  ;;  %v1330_v60 = vsel %vm546_vm8, %v2629_v53, %v1166_v38  ;;  %v1004_v55 = vsel %vm838_vm14, %v2667_v59, 0.0  ;;  %vm543_vm0 = vcmp.eq.s32.totalorder %v2380_v14, %v2541_v1  ;;  %vm688_vm1 = vcmp.eq.s32.totalorder %v2380_v14, %v2544_v41 }
  0x9a   : >> { %v1494_v46 = vsel %vm401_vm11, %v2645_v48, %v1330_v60  ;;  %v1168_v58 = vsel %vm693_vm13, %v2681_v40, %v1004_v55  ;;  %vm833_vm2 = vcmp.eq.s32.totalorder %v2380_v14, %v2547_v42  ;;  %vm398_vm3 = vcmp.eq.s32.totalorder %v2380_v14, %v2524_v57 }
  0x9b   : >> { %1581 = vmatpush1.msra.mxu0 %v1494_v46  ;;  %v1332_v39 = vsel %vm548_vm12, %v2688_v24, %v1168_v58  ;;  %v999_v29 = vsel %vm833_vm2, %v2527_v61, 0.0  ;;  %vm545_vm4 = vcmp.eq.s32.totalorder %v2380_v14, %v2553_v45  ;;  %vm690_vm5 = vcmp.eq.s32.totalorder %v2380_v14, %v2556_v50 }
  0x9c   : >> { %v1496_v37 = vsel %vm403_vm15, %v2691_v49, %v1332_v39  ;;  %v1163_v38 = vsel %vm688_vm1, %v2530_v62, %v999_v29  ;;  %vm835_vm6 = vcmp.eq.s32.totalorder %v2380_v14, %v2559_v51  ;;  %vm400_vm7 = vcmp.eq.s32.totalorder %v2380_v14, %v2550_v43 }
  0x9d   : >> { %1652 = vmatpush1.msra.mxu1 %v1496_v37  ;;  %v1327_v60 = vsel %vm543_vm0, %v2533_v63, %v1163_v38  ;;  %v1001_v55 = vsel %vm835_vm6, %v2568_v52, 0.0  ;;  %vm542_vm8 = vcmp.eq.s32.totalorder %v2380_v14, %v2598_v26  ;;  %vm687_vm9 = vcmp.eq.s32.totalorder %v2380_v14, %v2601_v56 }
  0x9e   : >> { %v1491_v46 = vsel %vm398_vm3, %v2536_v0, %v1327_v60  ;;  %v1165_v58 = vsel %vm690_vm5, %v2581_v21, %v1001_v55  ;;  %vm832_vm10 = vcmp.eq.s32.totalorder %v2380_v14, %v2610_v27  ;;  %vm397_vm11 = vcmp.eq.s32.totalorder %v2380_v14, %v2590_v25 }
  0x9f   : >> { %1582 = vmatprep.subr.mxu0 %v1491_v46  ;;  %v1329_v39 = vsel %vm545_vm4, %v2584_v54, %v1165_v58  ;;  %v998_v29 = vsel %vm832_vm10, %v2617_v22, 0.0  ;;  %vm544_vm12 = vcmp.eq.s32.totalorder %v2380_v14, %v2638_v28  ;;  %vm689_vm13 = vcmp.eq.s32.totalorder %v2380_v14, %v2641_v15 }
  0xa0   : >> { %v1493_v37 = vsel %vm400_vm7, %v2605_v44, %v1329_v39  ;;  %v1162_v38 = vsel %vm687_vm9, %v2620_v23, %v998_v29  ;;  %vm834_vm14 = vcmp.eq.s32.totalorder %v2380_v14, %v2648_v30  ;;  %vm399_vm15 = vcmp.eq.s32.totalorder %v2380_v14, %v2635_v47 }
  0xa1   : >> { %1653 = vmatprep.subr.mxu1 %v1493_v37  ;;  %v1326_v60 = vsel %vm542_vm8, %v2629_v53, %v1162_v38  ;;  %v1000_v55 = vsel %vm834_vm14, %v2667_v59, 0.0  ;;  %vm539_vm0 = vcmp.eq.s32.totalorder %v2377_v13, %v2541_v1  ;;  %vm684_vm1 = vcmp.eq.s32.totalorder %v2377_v13, %v2544_v41 }
  0xa2   : >> { %v1490_v46 = vsel %vm397_vm11, %v2645_v48, %v1326_v60  ;;  %v1164_v58 = vsel %vm689_vm13, %v2681_v40, %v1000_v55  ;;  %vm829_vm2 = vcmp.eq.s32.totalorder %v2377_v13, %v2547_v42  ;;  %vm394_vm3 = vcmp.eq.s32.totalorder %v2377_v13, %v2524_v57 }
  0xa3   : >> { %1583 = vmatpush1.msra.mxu0 %v1490_v46  ;;  %v1328_v39 = vsel %vm544_vm12, %v2688_v24, %v1164_v58  ;;  %v995_v29 = vsel %vm829_vm2, %v2527_v61, 0.0  ;;  %vm541_vm4 = vcmp.eq.s32.totalorder %v2377_v13, %v2553_v45  ;;  %vm686_vm5 = vcmp.eq.s32.totalorder %v2377_v13, %v2556_v50 }
  0xa4   : >> { %v1492_v37 = vsel %vm399_vm15, %v2691_v49, %v1328_v39  ;;  %v1159_v38 = vsel %vm684_vm1, %v2530_v62, %v995_v29  ;;  %vm831_vm6 = vcmp.eq.s32.totalorder %v2377_v13, %v2559_v51  ;;  %vm396_vm7 = vcmp.eq.s32.totalorder %v2377_v13, %v2550_v43 }
  0xa5   : >> { %1654 = vmatpush1.msra.mxu1 %v1492_v37  ;;  %v1323_v60 = vsel %vm539_vm0, %v2533_v63, %v1159_v38  ;;  %v997_v55 = vsel %vm831_vm6, %v2568_v52, 0.0  ;;  %vm538_vm8 = vcmp.eq.s32.totalorder %v2377_v13, %v2598_v26  ;;  %vm683_vm9 = vcmp.eq.s32.totalorder %v2377_v13, %v2601_v56 }
  0xa6   : >> { %v1487_v46 = vsel %vm394_vm3, %v2536_v0, %v1323_v60  ;;  %v1161_v58 = vsel %vm686_vm5, %v2581_v21, %v997_v55  ;;  %vm828_vm10 = vcmp.eq.s32.totalorder %v2377_v13, %v2610_v27  ;;  %vm393_vm11 = vcmp.eq.s32.totalorder %v2377_v13, %v2590_v25 }
  0xa7   : >> { %1584 = vmatprep.subr.mxu0 %v1487_v46  ;;  %v1325_v39 = vsel %vm541_vm4, %v2584_v54, %v1161_v58  ;;  %v994_v29 = vsel %vm828_vm10, %v2617_v22, 0.0  ;;  %vm540_vm12 = vcmp.eq.s32.totalorder %v2377_v13, %v2638_v28  ;;  %vm685_vm13 = vcmp.eq.s32.totalorder %v2377_v13, %v2641_v15 }
  0xa8   : >> { %v1489_v37 = vsel %vm396_vm7, %v2605_v44, %v1325_v39  ;;  %v1158_v38 = vsel %vm683_vm9, %v2620_v23, %v994_v29  ;;  %vm830_vm14 = vcmp.eq.s32.totalorder %v2377_v13, %v2648_v30  ;;  %vm395_vm15 = vcmp.eq.s32.totalorder %v2377_v13, %v2635_v47 }
  0xa9   : >> { %1655 = vmatprep.subr.mxu1 %v1489_v37  ;;  %v1322_v60 = vsel %vm538_vm8, %v2629_v53, %v1158_v38  ;;  %v996_v55 = vsel %vm830_vm14, %v2667_v59, 0.0  ;;  %vm535_vm0 = vcmp.eq.s32.totalorder %v2374_v12, %v2541_v1  ;;  %vm680_vm1 = vcmp.eq.s32.totalorder %v2374_v12, %v2544_v41 }
  0xaa   : >> { %v1486_v46 = vsel %vm393_vm11, %v2645_v48, %v1322_v60  ;;  %v1160_v58 = vsel %vm685_vm13, %v2681_v40, %v996_v55  ;;  %vm825_vm2 = vcmp.eq.s32.totalorder %v2374_v12, %v2547_v42  ;;  %vm390_vm3 = vcmp.eq.s32.totalorder %v2374_v12, %v2524_v57 }
  0xab   : >> { %1585 = vmatpush1.msra.mxu0 %v1486_v46  ;;  %v1324_v39 = vsel %vm540_vm12, %v2688_v24, %v1160_v58  ;;  %v991_v29 = vsel %vm825_vm2, %v2527_v61, 0.0  ;;  %vm537_vm4 = vcmp.eq.s32.totalorder %v2374_v12, %v2553_v45  ;;  %vm682_vm5 = vcmp.eq.s32.totalorder %v2374_v12, %v2556_v50 }
  0xac   : >> { %v1488_v37 = vsel %vm395_vm15, %v2691_v49, %v1324_v39  ;;  %v1155_v38 = vsel %vm680_vm1, %v2530_v62, %v991_v29  ;;  %vm827_vm6 = vcmp.eq.s32.totalorder %v2374_v12, %v2559_v51  ;;  %vm392_vm7 = vcmp.eq.s32.totalorder %v2374_v12, %v2550_v43 }
  0xad   : >> { %1656 = vmatpush1.msra.mxu1 %v1488_v37  ;;  %v1319_v60 = vsel %vm535_vm0, %v2533_v63, %v1155_v38  ;;  %v993_v55 = vsel %vm827_vm6, %v2568_v52, 0.0  ;;  %vm534_vm8 = vcmp.eq.s32.totalorder %v2374_v12, %v2598_v26  ;;  %vm679_vm9 = vcmp.eq.s32.totalorder %v2374_v12, %v2601_v56 }
  0xae   : >> { %v1483_v46 = vsel %vm390_vm3, %v2536_v0, %v1319_v60  ;;  %v1157_v58 = vsel %vm682_vm5, %v2581_v21, %v993_v55  ;;  %vm824_vm10 = vcmp.eq.s32.totalorder %v2374_v12, %v2610_v27  ;;  %vm389_vm11 = vcmp.eq.s32.totalorder %v2374_v12, %v2590_v25 }
  0xaf   : >> { %1586 = vmatprep.subr.mxu0 %v1483_v46  ;;  %v1321_v39 = vsel %vm537_vm4, %v2584_v54, %v1157_v58  ;;  %v990_v29 = vsel %vm824_vm10, %v2617_v22, 0.0  ;;  %vm536_vm12 = vcmp.eq.s32.totalorder %v2374_v12, %v2638_v28  ;;  %vm681_vm13 = vcmp.eq.s32.totalorder %v2374_v12, %v2641_v15 }
  0xb0   : >> { %v1485_v37 = vsel %vm392_vm7, %v2605_v44, %v1321_v39  ;;  %v1154_v38 = vsel %vm679_vm9, %v2620_v23, %v990_v29  ;;  %vm826_vm14 = vcmp.eq.s32.totalorder %v2374_v12, %v2648_v30  ;;  %vm391_vm15 = vcmp.eq.s32.totalorder %v2374_v12, %v2635_v47 }
  0xb1   : >> { %1657 = vmatprep.subr.mxu1 %v1485_v37  ;;  %v1318_v60 = vsel %vm534_vm8, %v2629_v53, %v1154_v38  ;;  %v992_v55 = vsel %vm826_vm14, %v2667_v59, 0.0  ;;  %vm531_vm0 = vcmp.eq.s32.totalorder %v2371_v11, %v2541_v1  ;;  %vm676_vm1 = vcmp.eq.s32.totalorder %v2371_v11, %v2544_v41 }
  0xb2   : >> { %v1482_v46 = vsel %vm389_vm11, %v2645_v48, %v1318_v60  ;;  %v1156_v58 = vsel %vm681_vm13, %v2681_v40, %v992_v55  ;;  %vm821_vm2 = vcmp.eq.s32.totalorder %v2371_v11, %v2547_v42  ;;  %vm386_vm3 = vcmp.eq.s32.totalorder %v2371_v11, %v2524_v57 }
  0xb3   : >> { %1587 = vmatpush1.msra.mxu0 %v1482_v46  ;;  %v1320_v39 = vsel %vm536_vm12, %v2688_v24, %v1156_v58  ;;  %v987_v29 = vsel %vm821_vm2, %v2527_v61, 0.0  ;;  %vm533_vm4 = vcmp.eq.s32.totalorder %v2371_v11, %v2553_v45  ;;  %vm678_vm5 = vcmp.eq.s32.totalorder %v2371_v11, %v2556_v50 }
  0xb4   : >> { %v1484_v37 = vsel %vm391_vm15, %v2691_v49, %v1320_v39  ;;  %v1151_v38 = vsel %vm676_vm1, %v2530_v62, %v987_v29  ;;  %vm823_vm6 = vcmp.eq.s32.totalorder %v2371_v11, %v2559_v51  ;;  %vm388_vm7 = vcmp.eq.s32.totalorder %v2371_v11, %v2550_v43 }
  0xb5   : >> { %1658 = vmatpush1.msra.mxu1 %v1484_v37  ;;  %v1315_v60 = vsel %vm531_vm0, %v2533_v63, %v1151_v38  ;;  %v989_v55 = vsel %vm823_vm6, %v2568_v52, 0.0  ;;  %vm530_vm8 = vcmp.eq.s32.totalorder %v2371_v11, %v2598_v26  ;;  %vm675_vm9 = vcmp.eq.s32.totalorder %v2371_v11, %v2601_v56 }
  0xb6   : >> { %v1479_v46 = vsel %vm386_vm3, %v2536_v0, %v1315_v60  ;;  %v1153_v58 = vsel %vm678_vm5, %v2581_v21, %v989_v55  ;;  %vm820_vm10 = vcmp.eq.s32.totalorder %v2371_v11, %v2610_v27  ;;  %vm385_vm11 = vcmp.eq.s32.totalorder %v2371_v11, %v2590_v25 }
  0xb7   : >> { %1588 = vmatprep.subr.mxu0 %v1479_v46  ;;  %v1317_v39 = vsel %vm533_vm4, %v2584_v54, %v1153_v58  ;;  %v986_v29 = vsel %vm820_vm10, %v2617_v22, 0.0  ;;  %vm532_vm12 = vcmp.eq.s32.totalorder %v2371_v11, %v2638_v28  ;;  %vm677_vm13 = vcmp.eq.s32.totalorder %v2371_v11, %v2641_v15 }
  0xb8   : >> { %v1481_v37 = vsel %vm388_vm7, %v2605_v44, %v1317_v39  ;;  %v1150_v38 = vsel %vm675_vm9, %v2620_v23, %v986_v29  ;;  %vm822_vm14 = vcmp.eq.s32.totalorder %v2371_v11, %v2648_v30  ;;  %vm387_vm15 = vcmp.eq.s32.totalorder %v2371_v11, %v2635_v47 }
  0xb9   : >> { %1659 = vmatprep.subr.mxu1 %v1481_v37  ;;  %v1314_v60 = vsel %vm530_vm8, %v2629_v53, %v1150_v38  ;;  %v988_v55 = vsel %vm822_vm14, %v2667_v59, 0.0  ;;  %vm527_vm0 = vcmp.eq.s32.totalorder %v2367_v10, %v2541_v1  ;;  %vm672_vm1 = vcmp.eq.s32.totalorder %v2367_v10, %v2544_v41 }
  0xba   : >> { %v1478_v46 = vsel %vm385_vm11, %v2645_v48, %v1314_v60  ;;  %v1152_v58 = vsel %vm677_vm13, %v2681_v40, %v988_v55  ;;  %vm817_vm2 = vcmp.eq.s32.totalorder %v2367_v10, %v2547_v42  ;;  %vm382_vm3 = vcmp.eq.s32.totalorder %v2367_v10, %v2524_v57 }
  0xbb   : >> { %1589 = vmatpush1.msra.mxu0 %v1478_v46  ;;  %v1316_v39 = vsel %vm532_vm12, %v2688_v24, %v1152_v58  ;;  %v983_v29 = vsel %vm817_vm2, %v2527_v61, 0.0  ;;  %vm529_vm4 = vcmp.eq.s32.totalorder %v2367_v10, %v2553_v45  ;;  %vm674_vm5 = vcmp.eq.s32.totalorder %v2367_v10, %v2556_v50 }
  0xbc   : >> { %v1480_v37 = vsel %vm387_vm15, %v2691_v49, %v1316_v39  ;;  %v1147_v38 = vsel %vm672_vm1, %v2530_v62, %v983_v29  ;;  %vm819_vm6 = vcmp.eq.s32.totalorder %v2367_v10, %v2559_v51  ;;  %vm384_vm7 = vcmp.eq.s32.totalorder %v2367_v10, %v2550_v43 }
  0xbd   : >> { %1660 = vmatpush1.msra.mxu1 %v1480_v37  ;;  %v1311_v60 = vsel %vm527_vm0, %v2533_v63, %v1147_v38  ;;  %v985_v55 = vsel %vm819_vm6, %v2568_v52, 0.0  ;;  %vm526_vm8 = vcmp.eq.s32.totalorder %v2367_v10, %v2598_v26  ;;  %vm671_vm9 = vcmp.eq.s32.totalorder %v2367_v10, %v2601_v56 }
  0xbe   : >> { %v1475_v46 = vsel %vm382_vm3, %v2536_v0, %v1311_v60  ;;  %v1149_v58 = vsel %vm674_vm5, %v2581_v21, %v985_v55  ;;  %vm816_vm10 = vcmp.eq.s32.totalorder %v2367_v10, %v2610_v27  ;;  %vm381_vm11 = vcmp.eq.s32.totalorder %v2367_v10, %v2590_v25 }
  0xbf   : >> { %1590 = vmatprep.subr.mxu0 %v1475_v46  ;;  %v1313_v39 = vsel %vm529_vm4, %v2584_v54, %v1149_v58  ;;  %v982_v29 = vsel %vm816_vm10, %v2617_v22, 0.0  ;;  %vm528_vm12 = vcmp.eq.s32.totalorder %v2367_v10, %v2638_v28  ;;  %vm673_vm13 = vcmp.eq.s32.totalorder %v2367_v10, %v2641_v15 }
  0xc0   : >> { %v1477_v37 = vsel %vm384_vm7, %v2605_v44, %v1313_v39  ;;  %v1146_v38 = vsel %vm671_vm9, %v2620_v23, %v982_v29  ;;  %vm818_vm14 = vcmp.eq.s32.totalorder %v2367_v10, %v2648_v30  ;;  %vm383_vm15 = vcmp.eq.s32.totalorder %v2367_v10, %v2635_v47 }
  0xc1   : >> { %1661 = vmatprep.subr.mxu1 %v1477_v37  ;;  %v1310_v60 = vsel %vm526_vm8, %v2629_v53, %v1146_v38  ;;  %v984_v55 = vsel %vm818_vm14, %v2667_v59, 0.0  ;;  %vm523_vm0 = vcmp.eq.s32.totalorder %v2364_v9, %v2541_v1  ;;  %vm668_vm1 = vcmp.eq.s32.totalorder %v2364_v9, %v2544_v41 }
  0xc2   : >> { %v1474_v46 = vsel %vm381_vm11, %v2645_v48, %v1310_v60  ;;  %v1148_v58 = vsel %vm673_vm13, %v2681_v40, %v984_v55  ;;  %vm813_vm2 = vcmp.eq.s32.totalorder %v2364_v9, %v2547_v42  ;;  %vm378_vm3 = vcmp.eq.s32.totalorder %v2364_v9, %v2524_v57 }
  0xc3   : >> { %1591 = vmatpush1.msra.mxu0 %v1474_v46  ;;  %v1312_v39 = vsel %vm528_vm12, %v2688_v24, %v1148_v58  ;;  %v979_v29 = vsel %vm813_vm2, %v2527_v61, 0.0  ;;  %vm525_vm4 = vcmp.eq.s32.totalorder %v2364_v9, %v2553_v45  ;;  %vm670_vm5 = vcmp.eq.s32.totalorder %v2364_v9, %v2556_v50 }
  0xc4   : >> { %v1476_v37 = vsel %vm383_vm15, %v2691_v49, %v1312_v39  ;;  %v1143_v38 = vsel %vm668_vm1, %v2530_v62, %v979_v29  ;;  %vm815_vm6 = vcmp.eq.s32.totalorder %v2364_v9, %v2559_v51  ;;  %vm380_vm7 = vcmp.eq.s32.totalorder %v2364_v9, %v2550_v43 }
  0xc5   : >> { %1662 = vmatpush1.msra.mxu1 %v1476_v37  ;;  %v1307_v60 = vsel %vm523_vm0, %v2533_v63, %v1143_v38  ;;  %v981_v55 = vsel %vm815_vm6, %v2568_v52, 0.0  ;;  %vm522_vm8 = vcmp.eq.s32.totalorder %v2364_v9, %v2598_v26  ;;  %vm667_vm9 = vcmp.eq.s32.totalorder %v2364_v9, %v2601_v56 }
  0xc6   : >> { %v1471_v46 = vsel %vm378_vm3, %v2536_v0, %v1307_v60  ;;  %v1145_v58 = vsel %vm670_vm5, %v2581_v21, %v981_v55  ;;  %vm812_vm10 = vcmp.eq.s32.totalorder %v2364_v9, %v2610_v27  ;;  %vm377_vm11 = vcmp.eq.s32.totalorder %v2364_v9, %v2590_v25 }
  0xc7   : >> { %1592 = vmatprep.subr.mxu0 %v1471_v46  ;;  %v1309_v39 = vsel %vm525_vm4, %v2584_v54, %v1145_v58  ;;  %v978_v29 = vsel %vm812_vm10, %v2617_v22, 0.0  ;;  %vm524_vm12 = vcmp.eq.s32.totalorder %v2364_v9, %v2638_v28  ;;  %vm669_vm13 = vcmp.eq.s32.totalorder %v2364_v9, %v2641_v15 }
  0xc8   : >> { %v1473_v37 = vsel %vm380_vm7, %v2605_v44, %v1309_v39  ;;  %v1142_v38 = vsel %vm667_vm9, %v2620_v23, %v978_v29  ;;  %vm814_vm14 = vcmp.eq.s32.totalorder %v2364_v9, %v2648_v30  ;;  %vm379_vm15 = vcmp.eq.s32.totalorder %v2364_v9, %v2635_v47 }
  0xc9   : >> { %1663 = vmatprep.subr.mxu1 %v1473_v37  ;;  %v1306_v60 = vsel %vm522_vm8, %v2629_v53, %v1142_v38  ;;  %v980_v55 = vsel %vm814_vm14, %v2667_v59, 0.0  ;;  %vm519_vm0 = vcmp.eq.s32.totalorder %v2361_v8, %v2541_v1  ;;  %vm664_vm1 = vcmp.eq.s32.totalorder %v2361_v8, %v2544_v41 }
  0xca   : >> { %v1470_v46 = vsel %vm377_vm11, %v2645_v48, %v1306_v60  ;;  %v1144_v58 = vsel %vm669_vm13, %v2681_v40, %v980_v55  ;;  %vm809_vm2 = vcmp.eq.s32.totalorder %v2361_v8, %v2547_v42  ;;  %vm374_vm3 = vcmp.eq.s32.totalorder %v2361_v8, %v2524_v57 }
  0xcb   : >> { %1593 = vmatpush1.msra.mxu0 %v1470_v46  ;;  %v1308_v39 = vsel %vm524_vm12, %v2688_v24, %v1144_v58  ;;  %v975_v29 = vsel %vm809_vm2, %v2527_v61, 0.0  ;;  %vm521_vm4 = vcmp.eq.s32.totalorder %v2361_v8, %v2553_v45  ;;  %vm666_vm5 = vcmp.eq.s32.totalorder %v2361_v8, %v2556_v50 }
  0xcc   : >> { %v1472_v37 = vsel %vm379_vm15, %v2691_v49, %v1308_v39  ;;  %v1139_v38 = vsel %vm664_vm1, %v2530_v62, %v975_v29  ;;  %vm811_vm6 = vcmp.eq.s32.totalorder %v2361_v8, %v2559_v51  ;;  %vm376_vm7 = vcmp.eq.s32.totalorder %v2361_v8, %v2550_v43 }
  0xcd   : >> { %1664 = vmatpush1.msra.mxu1 %v1472_v37  ;;  %v1303_v60 = vsel %vm519_vm0, %v2533_v63, %v1139_v38  ;;  %v977_v55 = vsel %vm811_vm6, %v2568_v52, 0.0  ;;  %vm518_vm8 = vcmp.eq.s32.totalorder %v2361_v8, %v2598_v26  ;;  %vm663_vm9 = vcmp.eq.s32.totalorder %v2361_v8, %v2601_v56 }
  0xce   : >> { %v1467_v46 = vsel %vm374_vm3, %v2536_v0, %v1303_v60  ;;  %v1141_v58 = vsel %vm666_vm5, %v2581_v21, %v977_v55  ;;  %vm808_vm10 = vcmp.eq.s32.totalorder %v2361_v8, %v2610_v27  ;;  %vm373_vm11 = vcmp.eq.s32.totalorder %v2361_v8, %v2590_v25 }
  0xcf   : >> { %1594 = vmatprep.subr.mxu0 %v1467_v46  ;;  %v1305_v39 = vsel %vm521_vm4, %v2584_v54, %v1141_v58  ;;  %v974_v29 = vsel %vm808_vm10, %v2617_v22, 0.0  ;;  %vm520_vm12 = vcmp.eq.s32.totalorder %v2361_v8, %v2638_v28  ;;  %vm665_vm13 = vcmp.eq.s32.totalorder %v2361_v8, %v2641_v15 }
  0xd0   : >> { %v1469_v37 = vsel %vm376_vm7, %v2605_v44, %v1305_v39  ;;  %v1138_v38 = vsel %vm663_vm9, %v2620_v23, %v974_v29  ;;  %vm810_vm14 = vcmp.eq.s32.totalorder %v2361_v8, %v2648_v30  ;;  %vm375_vm15 = vcmp.eq.s32.totalorder %v2361_v8, %v2635_v47 }
  0xd1   : >> { %1665 = vmatprep.subr.mxu1 %v1469_v37  ;;  %v1302_v60 = vsel %vm518_vm8, %v2629_v53, %v1138_v38  ;;  %v976_v55 = vsel %vm810_vm14, %v2667_v59, 0.0  ;;  %vm515_vm0 = vcmp.eq.s32.totalorder %v2358_v7, %v2541_v1  ;;  %vm660_vm1 = vcmp.eq.s32.totalorder %v2358_v7, %v2544_v41 }
  0xd2   : >> { %v1466_v46 = vsel %vm373_vm11, %v2645_v48, %v1302_v60  ;;  %v1140_v58 = vsel %vm665_vm13, %v2681_v40, %v976_v55  ;;  %vm805_vm2 = vcmp.eq.s32.totalorder %v2358_v7, %v2547_v42  ;;  %vm370_vm3 = vcmp.eq.s32.totalorder %v2358_v7, %v2524_v57 }
  0xd3   : >> { %1595 = vmatpush1.msra.mxu0 %v1466_v46  ;;  %v1304_v39 = vsel %vm520_vm12, %v2688_v24, %v1140_v58  ;;  %v971_v29 = vsel %vm805_vm2, %v2527_v61, 0.0  ;;  %vm517_vm4 = vcmp.eq.s32.totalorder %v2358_v7, %v2553_v45  ;;  %vm662_vm5 = vcmp.eq.s32.totalorder %v2358_v7, %v2556_v50 }
  0xd4   : >> { %v1468_v37 = vsel %vm375_vm15, %v2691_v49, %v1304_v39  ;;  %v1135_v38 = vsel %vm660_vm1, %v2530_v62, %v971_v29  ;;  %vm807_vm6 = vcmp.eq.s32.totalorder %v2358_v7, %v2559_v51  ;;  %vm372_vm7 = vcmp.eq.s32.totalorder %v2358_v7, %v2550_v43 }
  0xd5   : >> { %1666 = vmatpush1.msra.mxu1 %v1468_v37  ;;  %v1299_v60 = vsel %vm515_vm0, %v2533_v63, %v1135_v38  ;;  %v973_v55 = vsel %vm807_vm6, %v2568_v52, 0.0  ;;  %vm514_vm8 = vcmp.eq.s32.totalorder %v2358_v7, %v2598_v26  ;;  %vm659_vm9 = vcmp.eq.s32.totalorder %v2358_v7, %v2601_v56 }
  0xd6   : >> { %v1463_v46 = vsel %vm370_vm3, %v2536_v0, %v1299_v60  ;;  %v1137_v58 = vsel %vm662_vm5, %v2581_v21, %v973_v55  ;;  %vm804_vm10 = vcmp.eq.s32.totalorder %v2358_v7, %v2610_v27  ;;  %vm369_vm11 = vcmp.eq.s32.totalorder %v2358_v7, %v2590_v25 }
  0xd7   : >> { %1596 = vmatprep.subr.mxu0 %v1463_v46  ;;  %v1301_v39 = vsel %vm517_vm4, %v2584_v54, %v1137_v58  ;;  %v970_v29 = vsel %vm804_vm10, %v2617_v22, 0.0  ;;  %vm516_vm12 = vcmp.eq.s32.totalorder %v2358_v7, %v2638_v28  ;;  %vm661_vm13 = vcmp.eq.s32.totalorder %v2358_v7, %v2641_v15 }
  0xd8   : >> { %v1465_v37 = vsel %vm372_vm7, %v2605_v44, %v1301_v39  ;;  %v1134_v38 = vsel %vm659_vm9, %v2620_v23, %v970_v29  ;;  %vm806_vm14 = vcmp.eq.s32.totalorder %v2358_v7, %v2648_v30  ;;  %vm371_vm15 = vcmp.eq.s32.totalorder %v2358_v7, %v2635_v47 }
  0xd9   : >> { %1667 = vmatprep.subr.mxu1 %v1465_v37  ;;  %v1298_v60 = vsel %vm514_vm8, %v2629_v53, %v1134_v38  ;;  %v972_v55 = vsel %vm806_vm14, %v2667_v59, 0.0  ;;  %vm511_vm0 = vcmp.eq.s32.totalorder %v2352_v6, %v2541_v1  ;;  %vm656_vm1 = vcmp.eq.s32.totalorder %v2352_v6, %v2544_v41 }
  0xda   : >> { %v1462_v46 = vsel %vm369_vm11, %v2645_v48, %v1298_v60  ;;  %v1136_v58 = vsel %vm661_vm13, %v2681_v40, %v972_v55  ;;  %vm801_vm2 = vcmp.eq.s32.totalorder %v2352_v6, %v2547_v42  ;;  %vm366_vm3 = vcmp.eq.s32.totalorder %v2352_v6, %v2524_v57 }
  0xdb   : >> { %1597 = vmatpush1.msra.mxu0 %v1462_v46  ;;  %v1300_v39 = vsel %vm516_vm12, %v2688_v24, %v1136_v58  ;;  %v967_v29 = vsel %vm801_vm2, %v2527_v61, 0.0  ;;  %vm513_vm4 = vcmp.eq.s32.totalorder %v2352_v6, %v2553_v45  ;;  %vm658_vm5 = vcmp.eq.s32.totalorder %v2352_v6, %v2556_v50 }
  0xdc   : >> { %v1464_v37 = vsel %vm371_vm15, %v2691_v49, %v1300_v39  ;;  %v1131_v38 = vsel %vm656_vm1, %v2530_v62, %v967_v29  ;;  %vm803_vm6 = vcmp.eq.s32.totalorder %v2352_v6, %v2559_v51  ;;  %vm368_vm7 = vcmp.eq.s32.totalorder %v2352_v6, %v2550_v43 }
  0xdd   : >> { %1668 = vmatpush1.msra.mxu1 %v1464_v37  ;;  %v1295_v60 = vsel %vm511_vm0, %v2533_v63, %v1131_v38  ;;  %v969_v55 = vsel %vm803_vm6, %v2568_v52, 0.0  ;;  %vm510_vm8 = vcmp.eq.s32.totalorder %v2352_v6, %v2598_v26 }
  0xde   : >> { %2083 = shalt.err (!%p2080_p1)  }
  0xdf   : >> { %s2084_s21 = scalar_lea.vmem %s326_s26, 128  ;;  %p2091_p0 = scmp.lt.s32.totalorder %s326_s26, %s2411_s7 }
  0xe0   : >> { %p2085_p2 = scmp.ne.s32.totalorder %s326_s26, %s2084_s21  ;;  %s4386_s24 = scalar_lea.vmem %s2411_s7, 256 }
  0xe1   : >> { %p2092_p4 = scmp.lt.s32.totalorder %s4386_s24, %s2084_s21 }
  0xe2   : >> { %p2086_p3 = pnand %p2085_p2, %p1935_p9 }
  0xe3   : >> { %p2093_p8 = por %p2092_p4, %p2091_p0 }
  0xe4   : >> { %p2087_p6 = pneg %p2086_p3 }
  0xe6   : >> { %p2094_p7 = pnand %p2093_p8, %p2087_p6 }
  0xe8   : >> { %2097 = shalt.err (!%p2094_p7)  }
  0xe9   : >> { %1923 = dma.hbm_to_vmem [thread:$0]  (%p1935_p9), %s3206_s17, 128, %s326_s26, %s317_s13  ;;  %v1459_v46 = vsel %vm366_vm3, %v2536_v0, %v1295_v60  ;;  %v1133_v58 = vsel %vm658_vm5, %v2581_v21, %v969_v55  ;;  %vm655_vm9 = vcmp.eq.s32.totalorder %v2352_v6, %v2601_v56  ;;  %vm800_vm10 = vcmp.eq.s32.totalorder %v2352_v6, %v2610_v27 }
  0xea   : >> { %1598 = vmatprep.subr.mxu0 %v1459_v46  ;;  %v1297_v39 = vsel %vm513_vm4, %v2584_v54, %v1133_v58  ;;  %vm365_vm11 = vcmp.eq.s32.totalorder %v2352_v6, %v2590_v25  ;;  %v966_v29 = vsel %vm800_vm10, %v2617_v22, 0.0  ;;  %vm512_vm12 = vcmp.eq.s32.totalorder %v2352_v6, %v2638_v28  ;;  %s4397_s2 = smov %s3176_s22 }
  0xeb   : >> { %v1461_v37 = vsel %vm368_vm7, %v2605_v44, %v1297_v39  ;;  %v1130_v38 = vsel %vm655_vm9, %v2620_v23, %v966_v29  ;;  %vm657_vm13 = vcmp.eq.s32.totalorder %v2352_v6, %v2641_v15  ;;  %vm802_vm14 = vcmp.eq.s32.totalorder %v2352_v6, %v2648_v30  ;;  %p4398_p9 = scmp.ge.s32.totalorder %s4397_s2, %s2340_s23 }
  0xec   : >> { %1669 = vmatprep.subr.mxu1 %v1461_v37  ;;  %v1294_v60 = vsel %vm510_vm8, %v2629_v53, %v1130_v38  ;;  %vm367_vm15 = vcmp.eq.s32.totalorder %v2352_v6, %v2635_v47  ;;  %v968_v55 = vsel %vm802_vm14, %v2667_v59, 0.0  ;;  %vm507_vm0 = vcmp.eq.s32.totalorder %v2349_v5, %v2541_v1 }
  0xed   : >> { %v1458_v46 = vsel %vm365_vm11, %v2645_v48, %v1294_v60  ;;  %v1132_v58 = vsel %vm657_vm13, %v2681_v40, %v968_v55  ;;  %vm652_vm1 = vcmp.eq.s32.totalorder %v2349_v5, %v2544_v41  ;;  %vm797_vm2 = vcmp.eq.s32.totalorder %v2349_v5, %v2547_v42 }
  0xee   : >> { %1599 = vmatpush1.msra.mxu0 %v1458_v46  ;;  %v1296_v39 = vsel %vm512_vm12, %v2688_v24, %v1132_v58  ;;  %vm362_vm3 = vcmp.eq.s32.totalorder %v2349_v5, %v2524_v57  ;;  %v963_v29 = vsel %vm797_vm2, %v2527_v61, 0.0  ;;  %vm509_vm4 = vcmp.eq.s32.totalorder %v2349_v5, %v2553_v45 }
  0xef   : >> { %v1460_v37 = vsel %vm367_vm15, %v2691_v49, %v1296_v39  ;;  %v1127_v38 = vsel %vm652_vm1, %v2530_v62, %v963_v29  ;;  %vm654_vm5 = vcmp.eq.s32.totalorder %v2349_v5, %v2556_v50  ;;  %vm799_vm6 = vcmp.eq.s32.totalorder %v2349_v5, %v2559_v51 }
  0xf0   : >> { %1670 = vmatpush1.msra.mxu1 %v1460_v37  ;;  %v1291_v60 = vsel %vm507_vm0, %v2533_v63, %v1127_v38  ;;  %vm364_vm7 = vcmp.eq.s32.totalorder %v2349_v5, %v2550_v43  ;;  %v965_v55 = vsel %vm799_vm6, %v2568_v52, 0.0  ;;  %vm506_vm8 = vcmp.eq.s32.totalorder %v2349_v5, %v2598_v26 }
  0xf1   : >> { %v1455_v46 = vsel %vm362_vm3, %v2536_v0, %v1291_v60  ;;  %v1129_v58 = vsel %vm654_vm5, %v2581_v21, %v965_v55  ;;  %vm651_vm9 = vcmp.eq.s32.totalorder %v2349_v5, %v2601_v56  ;;  %vm796_vm10 = vcmp.eq.s32.totalorder %v2349_v5, %v2610_v27 }
  0xf2   : >> { %1600 = vmatprep.subr.mxu0 %v1455_v46  ;;  %v1293_v39 = vsel %vm509_vm4, %v2584_v54, %v1129_v58  ;;  %vm361_vm11 = vcmp.eq.s32.totalorder %v2349_v5, %v2590_v25  ;;  %v962_v29 = vsel %vm796_vm10, %v2617_v22, 0.0  ;;  %vm508_vm12 = vcmp.eq.s32.totalorder %v2349_v5, %v2638_v28 }
  0xf3   : >> { %v1457_v37 = vsel %vm364_vm7, %v2605_v44, %v1293_v39  ;;  %v1126_v38 = vsel %vm651_vm9, %v2620_v23, %v962_v29  ;;  %vm653_vm13 = vcmp.eq.s32.totalorder %v2349_v5, %v2641_v15  ;;  %vm798_vm14 = vcmp.eq.s32.totalorder %v2349_v5, %v2648_v30 }
  0xf4   : >> { %1671 = vmatprep.subr.mxu1 %v1457_v37  ;;  %v1290_v60 = vsel %vm506_vm8, %v2629_v53, %v1126_v38  ;;  %vm363_vm15 = vcmp.eq.s32.totalorder %v2349_v5, %v2635_v47  ;;  %v964_v55 = vsel %vm798_vm14, %v2667_v59, 0.0  ;;  %vm503_vm0 = vcmp.eq.s32.totalorder %v2346_v4, %v2541_v1 }
  0xf5   : >> { %v1454_v46 = vsel %vm361_vm11, %v2645_v48, %v1290_v60  ;;  %v1128_v58 = vsel %vm653_vm13, %v2681_v40, %v964_v55  ;;  %vm648_vm1 = vcmp.eq.s32.totalorder %v2346_v4, %v2544_v41  ;;  %vm793_vm2 = vcmp.eq.s32.totalorder %v2346_v4, %v2547_v42 }
  0xf6   : >> { %1601 = vmatpush1.msra.mxu0 %v1454_v46  ;;  %v1292_v39 = vsel %vm508_vm12, %v2688_v24, %v1128_v58  ;;  %vm358_vm3 = vcmp.eq.s32.totalorder %v2346_v4, %v2524_v57  ;;  %v959_v29 = vsel %vm793_vm2, %v2527_v61, 0.0  ;;  %vm505_vm4 = vcmp.eq.s32.totalorder %v2346_v4, %v2553_v45 }
  0xf7   : >> { %v1456_v37 = vsel %vm363_vm15, %v2691_v49, %v1292_v39  ;;  %v1123_v38 = vsel %vm648_vm1, %v2530_v62, %v959_v29  ;;  %vm650_vm5 = vcmp.eq.s32.totalorder %v2346_v4, %v2556_v50  ;;  %vm795_vm6 = vcmp.eq.s32.totalorder %v2346_v4, %v2559_v51 }
  0xf8   : >> { %1672 = vmatpush1.msra.mxu1 %v1456_v37  ;;  %v1287_v60 = vsel %vm503_vm0, %v2533_v63, %v1123_v38  ;;  %vm360_vm7 = vcmp.eq.s32.totalorder %v2346_v4, %v2550_v43  ;;  %v961_v55 = vsel %vm795_vm6, %v2568_v52, 0.0  ;;  %vm502_vm8 = vcmp.eq.s32.totalorder %v2346_v4, %v2598_v26 }
  0xf9   : >> { %v1451_v46 = vsel %vm358_vm3, %v2536_v0, %v1287_v60  ;;  %v1125_v58 = vsel %vm650_vm5, %v2581_v21, %v961_v55  ;;  %vm647_vm9 = vcmp.eq.s32.totalorder %v2346_v4, %v2601_v56  ;;  %vm792_vm10 = vcmp.eq.s32.totalorder %v2346_v4, %v2610_v27 }
  0xfa   : >> { %1602 = vmatprep.subr.mxu0 %v1451_v46  ;;  %v1289_v39 = vsel %vm505_vm4, %v2584_v54, %v1125_v58  ;;  %vm357_vm11 = vcmp.eq.s32.totalorder %v2346_v4, %v2590_v25  ;;  %v958_v29 = vsel %vm792_vm10, %v2617_v22, 0.0  ;;  %vm504_vm12 = vcmp.eq.s32.totalorder %v2346_v4, %v2638_v28 }
  0xfb   : >> { %v1453_v37 = vsel %vm360_vm7, %v2605_v44, %v1289_v39  ;;  %v1122_v38 = vsel %vm647_vm9, %v2620_v23, %v958_v29  ;;  %vm649_vm13 = vcmp.eq.s32.totalorder %v2346_v4, %v2641_v15  ;;  %vm794_vm14 = vcmp.eq.s32.totalorder %v2346_v4, %v2648_v30 }
  0xfc   : >> { %1673 = vmatprep.subr.mxu1 %v1453_v37  ;;  %v1286_v60 = vsel %vm502_vm8, %v2629_v53, %v1122_v38  ;;  %vm359_vm15 = vcmp.eq.s32.totalorder %v2346_v4, %v2635_v47  ;;  %v960_v55 = vsel %vm794_vm14, %v2667_v59, 0.0  ;;  %vm499_vm0 = vcmp.eq.s32.totalorder %v4380_v3, %v2541_v1 }
  0xfd   : >> { %v1450_v46 = vsel %vm357_vm11, %v2645_v48, %v1286_v60  ;;  %v1124_v58 = vsel %vm649_vm13, %v2681_v40, %v960_v55  ;;  %vm644_vm1 = vcmp.eq.s32.totalorder %v4380_v3, %v2544_v41  ;;  %vm789_vm2 = vcmp.eq.s32.totalorder %v4380_v3, %v2547_v42 }
  0xfe   : >> { %1603 = vmatpush1.msra.mxu0 %v1450_v46  ;;  %v1288_v39 = vsel %vm504_vm12, %v2688_v24, %v1124_v58  ;;  %vm354_vm3 = vcmp.eq.s32.totalorder %v4380_v3, %v2524_v57  ;;  %v955_v29 = vsel %vm789_vm2, %v2527_v61, 0.0  ;;  %vm501_vm4 = vcmp.eq.s32.totalorder %v4380_v3, %v2553_v45 }
  0xff   : >> { %v1452_v37 = vsel %vm359_vm15, %v2691_v49, %v1288_v39  ;;  %v1119_v38 = vsel %vm644_vm1, %v2530_v62, %v955_v29  ;;  %vm646_vm5 = vcmp.eq.s32.totalorder %v4380_v3, %v2556_v50  ;;  %vm791_vm6 = vcmp.eq.s32.totalorder %v4380_v3, %v2559_v51 }
 0x100   : >> { %1674 = vmatpush1.msra.mxu1 %v1452_v37  ;;  %v1283_v60 = vsel %vm499_vm0, %v2533_v63, %v1119_v38  ;;  %vm356_vm7 = vcmp.eq.s32.totalorder %v4380_v3, %v2550_v43  ;;  %v957_v55 = vsel %vm791_vm6, %v2568_v52, 0.0  ;;  %vm498_vm8 = vcmp.eq.s32.totalorder %v4380_v3, %v2598_v26 }
 0x101   : >> { %v1447_v46 = vsel %vm354_vm3, %v2536_v0, %v1283_v60  ;;  %v1121_v58 = vsel %vm646_vm5, %v2581_v21, %v957_v55  ;;  %vm643_vm9 = vcmp.eq.s32.totalorder %v4380_v3, %v2601_v56  ;;  %vm788_vm10 = vcmp.eq.s32.totalorder %v4380_v3, %v2610_v27 }
 0x102   : >> { %1604 = vmatprep.subr.mxu0 %v1447_v46  ;;  %v1285_v39 = vsel %vm501_vm4, %v2584_v54, %v1121_v58  ;;  %vm353_vm11 = vcmp.eq.s32.totalorder %v4380_v3, %v2590_v25  ;;  %v954_v29 = vsel %vm788_vm10, %v2617_v22, 0.0  ;;  %vm500_vm12 = vcmp.eq.s32.totalorder %v4380_v3, %v2638_v28 }
 0x103   : >> { %v1449_v37 = vsel %vm356_vm7, %v2605_v44, %v1285_v39  ;;  %v1118_v38 = vsel %vm643_vm9, %v2620_v23, %v954_v29  ;;  %vm645_vm13 = vcmp.eq.s32.totalorder %v4380_v3, %v2641_v15  ;;  %vm790_vm14 = vcmp.eq.s32.totalorder %v4380_v3, %v2648_v30 }
 0x104   : >> { %1675 = vmatprep.subr.mxu1 %v1449_v37  ;;  %v1282_v60 = vsel %vm498_vm8, %v2629_v53, %v1118_v38  ;;  %vm355_vm15 = vcmp.eq.s32.totalorder %v4380_v3, %v2635_v47  ;;  %v956_v55 = vsel %vm790_vm14, %v2667_v59, 0.0  ;;  %vm495_vm0 = vcmp.eq.s32.totalorder %v4381_v2, %v2541_v1  ;;  %v4390_v3 = vld [vmem:[#allocation33_spill] sm:$0xff] }
 0x105   : >> { %v1446_v46 = vsel %vm353_vm11, %v2645_v48, %v1282_v60  ;;  %v1120_v58 = vsel %vm645_vm13, %v2681_v40, %v956_v55  ;;  %vm640_vm1 = vcmp.eq.s32.totalorder %v4381_v2, %v2544_v41  ;;  %vm785_vm2 = vcmp.eq.s32.totalorder %v4381_v2, %v2547_v42 }
 0x106   : >> { %1605 = vmatpush1.msra.mxu0 %v1446_v46  ;;  %v1284_v39 = vsel %vm500_vm12, %v2688_v24, %v1120_v58  ;;  %vm350_vm3 = vcmp.eq.s32.totalorder %v4381_v2, %v2524_v57  ;;  %v951_v29 = vsel %vm785_vm2, %v2527_v61, 0.0  ;;  %vm497_vm4 = vcmp.eq.s32.totalorder %v4381_v2, %v2553_v45 }
 0x107   : >> { %v1448_v37 = vsel %vm355_vm15, %v2691_v49, %v1284_v39  ;;  %v1115_v38 = vsel %vm640_vm1, %v2530_v62, %v951_v29  ;;  %vm642_vm5 = vcmp.eq.s32.totalorder %v4381_v2, %v2556_v50  ;;  %vm787_vm6 = vcmp.eq.s32.totalorder %v4381_v2, %v2559_v51 }
 0x108   : >> { %1676 = vmatpush1.msra.mxu1 %v1448_v37  ;;  %v1279_v60 = vsel %vm495_vm0, %v2533_v63, %v1115_v38  ;;  %vm352_vm7 = vcmp.eq.s32.totalorder %v4381_v2, %v2550_v43  ;;  %v953_v55 = vsel %vm787_vm6, %v2568_v52, 0.0  ;;  %vm494_vm8 = vcmp.eq.s32.totalorder %v4381_v2, %v2598_v26 }
 0x109   : >> { %v1443_v46 = vsel %vm350_vm3, %v2536_v0, %v1279_v60  ;;  %v1117_v58 = vsel %vm642_vm5, %v2581_v21, %v953_v55  ;;  %vm639_vm9 = vcmp.eq.s32.totalorder %v4381_v2, %v2601_v56  ;;  %vm784_vm10 = vcmp.eq.s32.totalorder %v4381_v2, %v2610_v27 }
 0x10a   : >> { %1606 = vmatprep.subr.mxu0 %v1443_v46  ;;  %v1281_v39 = vsel %vm497_vm4, %v2584_v54, %v1117_v58  ;;  %vm349_vm11 = vcmp.eq.s32.totalorder %v4381_v2, %v2590_v25  ;;  %v950_v29 = vsel %vm784_vm10, %v2617_v22, 0.0  ;;  %vm496_vm12 = vcmp.eq.s32.totalorder %v4381_v2, %v2638_v28 }
 0x10b   : >> { %v1445_v37 = vsel %vm352_vm7, %v2605_v44, %v1281_v39  ;;  %v1114_v38 = vsel %vm639_vm9, %v2620_v23, %v950_v29  ;;  %vm641_vm13 = vcmp.eq.s32.totalorder %v4381_v2, %v2641_v15  ;;  %vm786_vm14 = vcmp.eq.s32.totalorder %v4381_v2, %v2648_v30 }
 0x10c   : >> { %1677 = vmatprep.subr.mxu1 %v1445_v37  ;;  %v1278_v60 = vsel %vm494_vm8, %v2629_v53, %v1114_v38  ;;  %vm351_vm15 = vcmp.eq.s32.totalorder %v4381_v2, %v2635_v47  ;;  %v952_v55 = vsel %vm786_vm14, %v2667_v59, 0.0  ;;  %vm619_vm0 = vcmp.eq.s32.totalorder %v2472_v36, %v2541_v1  ;;  %v4389_v2 = vld [vmem:[#allocation34_spill] sm:$0xff] }
 0x10d   : >> { %v1442_v46 = vsel %vm349_vm11, %v2645_v48, %v1278_v60  ;;  %v1116_v58 = vsel %vm641_vm13, %v2681_v40, %v952_v55  ;;  %vm764_vm1 = vcmp.eq.s32.totalorder %v2472_v36, %v2544_v41  ;;  %vm909_vm2 = vcmp.eq.s32.totalorder %v2472_v36, %v2547_v42 }
 0x10e   : >> { %1607 = vmatpush1.msra.mxu0 %v1442_v46  ;;  %v1280_v39 = vsel %vm496_vm12, %v2688_v24, %v1116_v58  ;;  %vm474_vm3 = vcmp.eq.s32.totalorder %v2472_v36, %v2524_v57  ;;  %v1075_v29 = vsel %vm909_vm2, %v2527_v61, 0.0  ;;  %vm621_vm4 = vcmp.eq.s32.totalorder %v2472_v36, %v2553_v45 }
 0x10f   : >> { %v1444_v37 = vsel %vm351_vm15, %v2691_v49, %v1280_v39  ;;  %v1239_v38 = vsel %vm764_vm1, %v2530_v62, %v1075_v29  ;;  %vm766_vm5 = vcmp.eq.s32.totalorder %v2472_v36, %v2556_v50  ;;  %vm911_vm6 = vcmp.eq.s32.totalorder %v2472_v36, %v2559_v51 }
 0x110   : >> { %1678 = vmatpush1.msra.mxu1 %v1444_v37  ;;  %v1403_v60 = vsel %vm619_vm0, %v2533_v63, %v1239_v38  ;;  %vm476_vm7 = vcmp.eq.s32.totalorder %v2472_v36, %v2550_v43  ;;  %v1077_v55 = vsel %vm911_vm6, %v2568_v52, 0.0  ;;  %vm618_vm8 = vcmp.eq.s32.totalorder %v2472_v36, %v2598_v26 }
 0x111   : >> { %v1567_v46 = vsel %vm474_vm3, %v2536_v0, %v1403_v60  ;;  %v1241_v58 = vsel %vm766_vm5, %v2581_v21, %v1077_v55  ;;  %vm763_vm9 = vcmp.eq.s32.totalorder %v2472_v36, %v2601_v56  ;;  %vm908_vm10 = vcmp.eq.s32.totalorder %v2472_v36, %v2610_v27 }
 0x112   : >> { %1608 = vmatprep.subr.mxu0 %v1567_v46  ;;  %v1405_v39 = vsel %vm621_vm4, %v2584_v54, %v1241_v58  ;;  %vm473_vm11 = vcmp.eq.s32.totalorder %v2472_v36, %v2590_v25  ;;  %v1074_v29 = vsel %vm908_vm10, %v2617_v22, 0.0  ;;  %vm620_vm12 = vcmp.eq.s32.totalorder %v2472_v36, %v2638_v28 }
 0x113   : >> { %v1569_v37 = vsel %vm476_vm7, %v2605_v44, %v1405_v39  ;;  %v1238_v38 = vsel %vm763_vm9, %v2620_v23, %v1074_v29  ;;  %vm765_vm13 = vcmp.eq.s32.totalorder %v2472_v36, %v2641_v15  ;;  %vm910_vm14 = vcmp.eq.s32.totalorder %v2472_v36, %v2648_v30 }
 0x114   : >> { %1679 = vmatprep.subr.mxu1 %v1569_v37  ;;  %v1402_v60 = vsel %vm618_vm8, %v2629_v53, %v1238_v38  ;;  %vm475_vm15 = vcmp.eq.s32.totalorder %v2472_v36, %v2635_v47  ;;  %v1076_v55 = vsel %vm910_vm14, %v2667_v59, 0.0  ;;  %vm615_vm0 = vcmp.eq.s32.totalorder %v2451_v35, %v2541_v1 }
 0x115   : >> { %v1566_v46 = vsel %vm473_vm11, %v2645_v48, %v1402_v60  ;;  %v1240_v58 = vsel %vm765_vm13, %v2681_v40, %v1076_v55  ;;  %vm760_vm1 = vcmp.eq.s32.totalorder %v2451_v35, %v2544_v41  ;;  %vm905_vm2 = vcmp.eq.s32.totalorder %v2451_v35, %v2547_v42 }
 0x116   : >> { %1609 = vmatpush2.msra.mxu0 %v1566_v46  ;;  %v1404_v39 = vsel %vm620_vm12, %v2688_v24, %v1240_v58  ;;  %vm470_vm3 = vcmp.eq.s32.totalorder %v2451_v35, %v2524_v57  ;;  %v1071_v29 = vsel %vm905_vm2, %v2527_v61, 0.0  ;;  %vm617_vm4 = vcmp.eq.s32.totalorder %v2451_v35, %v2553_v45 }
 0x117   : >> { %v1568_v37 = vsel %vm475_vm15, %v2691_v49, %v1404_v39  ;;  %v1235_v38 = vsel %vm760_vm1, %v2530_v62, %v1071_v29  ;;  %vm762_vm5 = vcmp.eq.s32.totalorder %v2451_v35, %v2556_v50  ;;  %vm907_vm6 = vcmp.eq.s32.totalorder %v2451_v35, %v2559_v51 }
 0x118   : >> { %1680 = vmatpush2.msra.mxu1 %v1568_v37  ;;  %v1399_v60 = vsel %vm615_vm0, %v2533_v63, %v1235_v38  ;;  %vm472_vm7 = vcmp.eq.s32.totalorder %v2451_v35, %v2550_v43  ;;  %v1073_v55 = vsel %vm907_vm6, %v2568_v52, 0.0  ;;  %vm614_vm8 = vcmp.eq.s32.totalorder %v2451_v35, %v2598_v26 }
 0x119   : >> { %v1563_v46 = vsel %vm470_vm3, %v2536_v0, %v1399_v60  ;;  %v1237_v58 = vsel %vm762_vm5, %v2581_v21, %v1073_v55  ;;  %vm759_vm9 = vcmp.eq.s32.totalorder %v2451_v35, %v2601_v56  ;;  %vm904_vm10 = vcmp.eq.s32.totalorder %v2451_v35, %v2610_v27 }
 0x11a   : >> { %1610 = vmatprep.subr.mxu0 %v1563_v46  ;;  %v1401_v39 = vsel %vm617_vm4, %v2584_v54, %v1237_v58  ;;  %vm469_vm11 = vcmp.eq.s32.totalorder %v2451_v35, %v2590_v25  ;;  %v1070_v29 = vsel %vm904_vm10, %v2617_v22, 0.0  ;;  %vm616_vm12 = vcmp.eq.s32.totalorder %v2451_v35, %v2638_v28 }
 0x11b   : >> { %v1565_v37 = vsel %vm472_vm7, %v2605_v44, %v1401_v39  ;;  %v1234_v38 = vsel %vm759_vm9, %v2620_v23, %v1070_v29  ;;  %vm761_vm13 = vcmp.eq.s32.totalorder %v2451_v35, %v2641_v15  ;;  %vm906_vm14 = vcmp.eq.s32.totalorder %v2451_v35, %v2648_v30 }
 0x11c   : >> { %1681 = vmatprep.subr.mxu1 %v1565_v37  ;;  %v1398_v60 = vsel %vm614_vm8, %v2629_v53, %v1234_v38  ;;  %vm471_vm15 = vcmp.eq.s32.totalorder %v2451_v35, %v2635_v47  ;;  %v1072_v55 = vsel %vm906_vm14, %v2667_v59, 0.0  ;;  %vm611_vm0 = vcmp.eq.s32.totalorder %v2448_v34, %v2541_v1 }
 0x11d   : >> { %v1562_v46 = vsel %vm469_vm11, %v2645_v48, %v1398_v60  ;;  %v1236_v58 = vsel %vm761_vm13, %v2681_v40, %v1072_v55  ;;  %vm756_vm1 = vcmp.eq.s32.totalorder %v2448_v34, %v2544_v41  ;;  %vm901_vm2 = vcmp.eq.s32.totalorder %v2448_v34, %v2547_v42 }
 0x11e   : >> { %1611 = vmatpush2.msra.mxu0 %v1562_v46  ;;  %v1400_v39 = vsel %vm616_vm12, %v2688_v24, %v1236_v58  ;;  %vm466_vm3 = vcmp.eq.s32.totalorder %v2448_v34, %v2524_v57  ;;  %v1067_v29 = vsel %vm901_vm2, %v2527_v61, 0.0  ;;  %vm613_vm4 = vcmp.eq.s32.totalorder %v2448_v34, %v2553_v45 }
 0x11f   : >> { %v1564_v37 = vsel %vm471_vm15, %v2691_v49, %v1400_v39  ;;  %v1231_v38 = vsel %vm756_vm1, %v2530_v62, %v1067_v29  ;;  %vm758_vm5 = vcmp.eq.s32.totalorder %v2448_v34, %v2556_v50  ;;  %vm903_vm6 = vcmp.eq.s32.totalorder %v2448_v34, %v2559_v51 }
 0x120   : >> { %1682 = vmatpush2.msra.mxu1 %v1564_v37  ;;  %v1395_v60 = vsel %vm611_vm0, %v2533_v63, %v1231_v38  ;;  %vm468_vm7 = vcmp.eq.s32.totalorder %v2448_v34, %v2550_v43  ;;  %v1069_v55 = vsel %vm903_vm6, %v2568_v52, 0.0  ;;  %vm610_vm8 = vcmp.eq.s32.totalorder %v2448_v34, %v2598_v26 }
 0x121   : >> { %v1559_v46 = vsel %vm466_vm3, %v2536_v0, %v1395_v60  ;;  %v1233_v58 = vsel %vm758_vm5, %v2581_v21, %v1069_v55  ;;  %vm755_vm9 = vcmp.eq.s32.totalorder %v2448_v34, %v2601_v56  ;;  %vm900_vm10 = vcmp.eq.s32.totalorder %v2448_v34, %v2610_v27 }
 0x122   : >> { %1612 = vmatprep.subr.mxu0 %v1559_v46  ;;  %v1397_v39 = vsel %vm613_vm4, %v2584_v54, %v1233_v58  ;;  %vm465_vm11 = vcmp.eq.s32.totalorder %v2448_v34, %v2590_v25  ;;  %v1066_v29 = vsel %vm900_vm10, %v2617_v22, 0.0  ;;  %vm612_vm12 = vcmp.eq.s32.totalorder %v2448_v34, %v2638_v28 }
 0x123   : >> { %v1561_v37 = vsel %vm468_vm7, %v2605_v44, %v1397_v39  ;;  %v1230_v38 = vsel %vm755_vm9, %v2620_v23, %v1066_v29  ;;  %vm757_vm13 = vcmp.eq.s32.totalorder %v2448_v34, %v2641_v15  ;;  %vm902_vm14 = vcmp.eq.s32.totalorder %v2448_v34, %v2648_v30 }
 0x124   : >> { %1683 = vmatprep.subr.mxu1 %v1561_v37  ;;  %v1394_v60 = vsel %vm610_vm8, %v2629_v53, %v1230_v38  ;;  %vm467_vm15 = vcmp.eq.s32.totalorder %v2448_v34, %v2635_v47  ;;  %v1068_v55 = vsel %vm902_vm14, %v2667_v59, 0.0  ;;  %vm607_vm0 = vcmp.eq.s32.totalorder %v2445_v33, %v2541_v1 }
 0x125   : >> { %v1558_v46 = vsel %vm465_vm11, %v2645_v48, %v1394_v60  ;;  %v1232_v58 = vsel %vm757_vm13, %v2681_v40, %v1068_v55  ;;  %vm752_vm1 = vcmp.eq.s32.totalorder %v2445_v33, %v2544_v41  ;;  %vm897_vm2 = vcmp.eq.s32.totalorder %v2445_v33, %v2547_v42 }
 0x126   : >> { %1613 = vmatpush2.msra.mxu0 %v1558_v46  ;;  %v1396_v39 = vsel %vm612_vm12, %v2688_v24, %v1232_v58  ;;  %vm462_vm3 = vcmp.eq.s32.totalorder %v2445_v33, %v2524_v57  ;;  %v1063_v29 = vsel %vm897_vm2, %v2527_v61, 0.0  ;;  %vm609_vm4 = vcmp.eq.s32.totalorder %v2445_v33, %v2553_v45 }
 0x127   : >> { %v1560_v37 = vsel %vm467_vm15, %v2691_v49, %v1396_v39  ;;  %v1227_v38 = vsel %vm752_vm1, %v2530_v62, %v1063_v29  ;;  %vm754_vm5 = vcmp.eq.s32.totalorder %v2445_v33, %v2556_v50  ;;  %vm899_vm6 = vcmp.eq.s32.totalorder %v2445_v33, %v2559_v51 }
 0x128   : >> { %1684 = vmatpush2.msra.mxu1 %v1560_v37  ;;  %v1391_v60 = vsel %vm607_vm0, %v2533_v63, %v1227_v38  ;;  %vm464_vm7 = vcmp.eq.s32.totalorder %v2445_v33, %v2550_v43  ;;  %v1065_v55 = vsel %vm899_vm6, %v2568_v52, 0.0  ;;  %vm606_vm8 = vcmp.eq.s32.totalorder %v2445_v33, %v2598_v26 }
 0x129   : >> { %v1555_v46 = vsel %vm462_vm3, %v2536_v0, %v1391_v60  ;;  %v1229_v58 = vsel %vm754_vm5, %v2581_v21, %v1065_v55  ;;  %vm751_vm9 = vcmp.eq.s32.totalorder %v2445_v33, %v2601_v56  ;;  %vm896_vm10 = vcmp.eq.s32.totalorder %v2445_v33, %v2610_v27 }
 0x12a   : >> { %1614 = vmatprep.subr.mxu0 %v1555_v46  ;;  %v1393_v39 = vsel %vm609_vm4, %v2584_v54, %v1229_v58  ;;  %vm461_vm11 = vcmp.eq.s32.totalorder %v2445_v33, %v2590_v25  ;;  %v1062_v29 = vsel %vm896_vm10, %v2617_v22, 0.0  ;;  %vm608_vm12 = vcmp.eq.s32.totalorder %v2445_v33, %v2638_v28 }
 0x12b   : >> { %v1557_v37 = vsel %vm464_vm7, %v2605_v44, %v1393_v39  ;;  %v1226_v38 = vsel %vm751_vm9, %v2620_v23, %v1062_v29  ;;  %vm753_vm13 = vcmp.eq.s32.totalorder %v2445_v33, %v2641_v15  ;;  %vm898_vm14 = vcmp.eq.s32.totalorder %v2445_v33, %v2648_v30 }
 0x12c   : >> { %1685 = vmatprep.subr.mxu1 %v1557_v37  ;;  %v1390_v60 = vsel %vm606_vm8, %v2629_v53, %v1226_v38  ;;  %vm463_vm15 = vcmp.eq.s32.totalorder %v2445_v33, %v2635_v47  ;;  %v1064_v55 = vsel %vm898_vm14, %v2667_v59, 0.0  ;;  %vm603_vm0 = vcmp.eq.s32.totalorder %v2442_v32, %v2541_v1 }
 0x12d   : >> { %v1554_v46 = vsel %vm461_vm11, %v2645_v48, %v1390_v60  ;;  %v1228_v58 = vsel %vm753_vm13, %v2681_v40, %v1064_v55  ;;  %vm748_vm1 = vcmp.eq.s32.totalorder %v2442_v32, %v2544_v41  ;;  %vm893_vm2 = vcmp.eq.s32.totalorder %v2442_v32, %v2547_v42 }
 0x12e   : >> { %1615 = vmatpush2.msra.mxu0 %v1554_v46  ;;  %v1392_v39 = vsel %vm608_vm12, %v2688_v24, %v1228_v58  ;;  %vm458_vm3 = vcmp.eq.s32.totalorder %v2442_v32, %v2524_v57  ;;  %v1059_v29 = vsel %vm893_vm2, %v2527_v61, 0.0  ;;  %vm605_vm4 = vcmp.eq.s32.totalorder %v2442_v32, %v2553_v45 }
 0x12f   : >> { %v1556_v37 = vsel %vm463_vm15, %v2691_v49, %v1392_v39  ;;  %v1223_v38 = vsel %vm748_vm1, %v2530_v62, %v1059_v29  ;;  %vm750_vm5 = vcmp.eq.s32.totalorder %v2442_v32, %v2556_v50  ;;  %vm895_vm6 = vcmp.eq.s32.totalorder %v2442_v32, %v2559_v51 }
 0x130   : >> { %1686 = vmatpush2.msra.mxu1 %v1556_v37  ;;  %v1387_v60 = vsel %vm603_vm0, %v2533_v63, %v1223_v38  ;;  %vm460_vm7 = vcmp.eq.s32.totalorder %v2442_v32, %v2550_v43  ;;  %v1061_v55 = vsel %vm895_vm6, %v2568_v52, 0.0  ;;  %vm602_vm8 = vcmp.eq.s32.totalorder %v2442_v32, %v2598_v26 }
 0x131   : >> { %v1551_v46 = vsel %vm458_vm3, %v2536_v0, %v1387_v60  ;;  %v1225_v58 = vsel %vm750_vm5, %v2581_v21, %v1061_v55  ;;  %vm747_vm9 = vcmp.eq.s32.totalorder %v2442_v32, %v2601_v56  ;;  %vm892_vm10 = vcmp.eq.s32.totalorder %v2442_v32, %v2610_v27 }
 0x132   : >> { %1616 = vmatprep.subr.mxu0 %v1551_v46  ;;  %v1389_v39 = vsel %vm605_vm4, %v2584_v54, %v1225_v58  ;;  %vm457_vm11 = vcmp.eq.s32.totalorder %v2442_v32, %v2590_v25  ;;  %v1058_v29 = vsel %vm892_vm10, %v2617_v22, 0.0  ;;  %vm604_vm12 = vcmp.eq.s32.totalorder %v2442_v32, %v2638_v28 }
 0x133   : >> { %v1553_v37 = vsel %vm460_vm7, %v2605_v44, %v1389_v39  ;;  %v1222_v38 = vsel %vm747_vm9, %v2620_v23, %v1058_v29  ;;  %vm749_vm13 = vcmp.eq.s32.totalorder %v2442_v32, %v2641_v15  ;;  %vm894_vm14 = vcmp.eq.s32.totalorder %v2442_v32, %v2648_v30 }
 0x134   : >> { %1687 = vmatprep.subr.mxu1 %v1553_v37  ;;  %v1386_v60 = vsel %vm602_vm8, %v2629_v53, %v1222_v38  ;;  %vm459_vm15 = vcmp.eq.s32.totalorder %v2442_v32, %v2635_v47  ;;  %v1060_v55 = vsel %vm894_vm14, %v2667_v59, 0.0  ;;  %vm599_vm0 = vcmp.eq.s32.totalorder %v2436_v31, %v2541_v1 }
 0x135   : >> { %v1550_v46 = vsel %vm457_vm11, %v2645_v48, %v1386_v60  ;;  %v1224_v58 = vsel %vm749_vm13, %v2681_v40, %v1060_v55  ;;  %vm744_vm1 = vcmp.eq.s32.totalorder %v2436_v31, %v2544_v41  ;;  %vm889_vm2 = vcmp.eq.s32.totalorder %v2436_v31, %v2547_v42 }
 0x136   : >> { %1617 = vmatpush2.msra.mxu0 %v1550_v46  ;;  %v1388_v39 = vsel %vm604_vm12, %v2688_v24, %v1224_v58  ;;  %vm454_vm3 = vcmp.eq.s32.totalorder %v2436_v31, %v2524_v57  ;;  %v1055_v29 = vsel %vm889_vm2, %v2527_v61, 0.0  ;;  %vm601_vm4 = vcmp.eq.s32.totalorder %v2436_v31, %v2553_v45 }
 0x137   : >> { %v1552_v37 = vsel %vm459_vm15, %v2691_v49, %v1388_v39  ;;  %v1219_v38 = vsel %vm744_vm1, %v2530_v62, %v1055_v29  ;;  %vm746_vm5 = vcmp.eq.s32.totalorder %v2436_v31, %v2556_v50  ;;  %vm891_vm6 = vcmp.eq.s32.totalorder %v2436_v31, %v2559_v51 }
 0x138   : >> { %1688 = vmatpush2.msra.mxu1 %v1552_v37  ;;  %v1383_v60 = vsel %vm599_vm0, %v2533_v63, %v1219_v38  ;;  %vm456_vm7 = vcmp.eq.s32.totalorder %v2436_v31, %v2550_v43  ;;  %v1057_v55 = vsel %vm891_vm6, %v2568_v52, 0.0  ;;  %vm598_vm8 = vcmp.eq.s32.totalorder %v2436_v31, %v2598_v26 }
 0x139   : >> { %v1547_v46 = vsel %vm454_vm3, %v2536_v0, %v1383_v60  ;;  %v1221_v58 = vsel %vm746_vm5, %v2581_v21, %v1057_v55  ;;  %vm743_vm9 = vcmp.eq.s32.totalorder %v2436_v31, %v2601_v56  ;;  %vm888_vm10 = vcmp.eq.s32.totalorder %v2436_v31, %v2610_v27 }
 0x13a   : >> { %1618 = vmatprep.subr.mxu0 %v1547_v46  ;;  %v1385_v39 = vsel %vm601_vm4, %v2584_v54, %v1221_v58  ;;  %vm453_vm11 = vcmp.eq.s32.totalorder %v2436_v31, %v2590_v25  ;;  %v1054_v29 = vsel %vm888_vm10, %v2617_v22, 0.0  ;;  %vm600_vm12 = vcmp.eq.s32.totalorder %v2436_v31, %v2638_v28  ;;  %v4387_v46 = vld [vmem:[#allocation36_spill] sm:$0xff] }
 0x13b   : >> { %v1549_v37 = vsel %vm456_vm7, %v2605_v44, %v1385_v39  ;;  %v1218_v38 = vsel %vm743_vm9, %v2620_v23, %v1054_v29  ;;  %vm745_vm13 = vcmp.eq.s32.totalorder %v2436_v31, %v2641_v15  ;;  %vm890_vm14 = vcmp.eq.s32.totalorder %v2436_v31, %v2648_v30 }
 0x13c   : >> { %1689 = vmatprep.subr.mxu1 %v1549_v37  ;;  %v1382_v60 = vsel %vm598_vm8, %v2629_v53, %v1218_v38  ;;  %vm455_vm15 = vcmp.eq.s32.totalorder %v2436_v31, %v2635_v47  ;;  %v1056_v55 = vsel %vm890_vm14, %v2667_v59, 0.0  ;;  %vm595_vm0 = vcmp.eq.s32.totalorder %v4387_v46, %v2541_v1 }
 0x13d   : >> { %v1546_v58 = vsel %vm453_vm11, %v2645_v48, %v1382_v60  ;;  %v1220_v39 = vsel %vm745_vm13, %v2681_v40, %v1056_v55  ;;  %vm740_vm1 = vcmp.eq.s32.totalorder %v4387_v46, %v2544_v41  ;;  %vm885_vm2 = vcmp.eq.s32.totalorder %v4387_v46, %v2547_v42 }
 0x13e   : >> { %1619 = vmatpush2.msra.mxu0 %v1546_v58  ;;  %v1384_v29 = vsel %vm600_vm12, %v2688_v24, %v1220_v39  ;;  %vm450_vm3 = vcmp.eq.s32.totalorder %v4387_v46, %v2524_v57  ;;  %v1051_v37 = vsel %vm885_vm2, %v2527_v61, 0.0  ;;  %vm597_vm4 = vcmp.eq.s32.totalorder %v4387_v46, %v2553_v45 }
 0x13f   : >> { %v1548_v38 = vsel %vm455_vm15, %v2691_v49, %v1384_v29  ;;  %v1215_v60 = vsel %vm740_vm1, %v2530_v62, %v1051_v37  ;;  %vm742_vm5 = vcmp.eq.s32.totalorder %v4387_v46, %v2556_v50  ;;  %vm887_vm6 = vcmp.eq.s32.totalorder %v4387_v46, %v2559_v51 }
 0x140   : >> { %1690 = vmatpush2.msra.mxu1 %v1548_v38  ;;  %v1379_v55 = vsel %vm595_vm0, %v2533_v63, %v1215_v60  ;;  %vm452_vm7 = vcmp.eq.s32.totalorder %v4387_v46, %v2550_v43  ;;  %v1053_v58 = vsel %vm887_vm6, %v2568_v52, 0.0  ;;  %vm594_vm8 = vcmp.eq.s32.totalorder %v4387_v46, %v2598_v26 }
 0x141   : >> { %v1543_v39 = vsel %vm450_vm3, %v2536_v0, %v1379_v55  ;;  %v1217_v29 = vsel %vm742_vm5, %v2581_v21, %v1053_v58  ;;  %vm739_vm9 = vcmp.eq.s32.totalorder %v4387_v46, %v2601_v56  ;;  %vm884_vm10 = vcmp.eq.s32.totalorder %v4387_v46, %v2610_v27 }
 0x142   : >> { %1620 = vmatprep.subr.mxu0 %v1543_v39  ;;  %v1381_v37 = vsel %vm597_vm4, %v2584_v54, %v1217_v29  ;;  %vm449_vm11 = vcmp.eq.s32.totalorder %v4387_v46, %v2590_v25  ;;  %v1050_v38 = vsel %vm884_vm10, %v2617_v22, 0.0  ;;  %vm596_vm12 = vcmp.eq.s32.totalorder %v4387_v46, %v2638_v28  ;;  %v4388_v29 = vld [vmem:[#allocation35_spill] sm:$0xff] }
 0x143   : >> { %v1545_v60 = vsel %vm452_vm7, %v2605_v44, %v1381_v37  ;;  %v1214_v55 = vsel %vm739_vm9, %v2620_v23, %v1050_v38  ;;  %vm741_vm13 = vcmp.eq.s32.totalorder %v4387_v46, %v2641_v15  ;;  %vm886_vm14 = vcmp.eq.s32.totalorder %v4387_v46, %v2648_v30 }
 0x144   : >> { %1691 = vmatprep.subr.mxu1 %v1545_v60  ;;  %v1378_v58 = vsel %vm594_vm8, %v2629_v53, %v1214_v55  ;;  %vm451_vm15 = vcmp.eq.s32.totalorder %v4387_v46, %v2635_v47  ;;  %v1052_v39 = vsel %vm886_vm14, %v2667_v59, 0.0  ;;  %vm591_vm0 = vcmp.eq.s32.totalorder %v4388_v29, %v2541_v1 }
 0x145   : >> { %v1542_v37 = vsel %vm449_vm11, %v2645_v48, %v1378_v58  ;;  %v1216_v38 = vsel %vm741_vm13, %v2681_v40, %v1052_v39  ;;  %vm736_vm1 = vcmp.eq.s32.totalorder %v4388_v29, %v2544_v41  ;;  %vm881_vm2 = vcmp.eq.s32.totalorder %v4388_v29, %v2547_v42 }
 0x146   : >> { %1621 = vmatpush2.msra.mxu0 %v1542_v37  ;;  %v1380_v60 = vsel %vm596_vm12, %v2688_v24, %v1216_v38  ;;  %vm446_vm3 = vcmp.eq.s32.totalorder %v4388_v29, %v2524_v57  ;;  %v1047_v55 = vsel %vm881_vm2, %v2527_v61, 0.0  ;;  %vm593_vm4 = vcmp.eq.s32.totalorder %v4388_v29, %v2553_v45 }
 0x147   : >> { %v1544_v58 = vsel %vm451_vm15, %v2691_v49, %v1380_v60  ;;  %v1211_v39 = vsel %vm736_vm1, %v2530_v62, %v1047_v55  ;;  %vm738_vm5 = vcmp.eq.s32.totalorder %v4388_v29, %v2556_v50  ;;  %vm883_vm6 = vcmp.eq.s32.totalorder %v4388_v29, %v2559_v51 }
 0x148   : >> { %1692 = vmatpush2.msra.mxu1 %v1544_v58  ;;  %v1375_v37 = vsel %vm591_vm0, %v2533_v63, %v1211_v39  ;;  %vm448_vm7 = vcmp.eq.s32.totalorder %v4388_v29, %v2550_v43  ;;  %v1049_v38 = vsel %vm883_vm6, %v2568_v52, 0.0  ;;  %vm590_vm8 = vcmp.eq.s32.totalorder %v4388_v29, %v2598_v26 }
 0x149   : >> { %v1539_v60 = vsel %vm446_vm3, %v2536_v0, %v1375_v37  ;;  %v1213_v55 = vsel %vm738_vm5, %v2581_v21, %v1049_v38  ;;  %vm735_vm9 = vcmp.eq.s32.totalorder %v4388_v29, %v2601_v56  ;;  %vm880_vm10 = vcmp.eq.s32.totalorder %v4388_v29, %v2610_v27 }
 0x14a   : >> { %1622 = vmatprep.subr.mxu0 %v1539_v60  ;;  %v1377_v58 = vsel %vm593_vm4, %v2584_v54, %v1213_v55  ;;  %vm445_vm11 = vcmp.eq.s32.totalorder %v4388_v29, %v2590_v25  ;;  %v1046_v39 = vsel %vm880_vm10, %v2617_v22, 0.0  ;;  %vm592_vm12 = vcmp.eq.s32.totalorder %v4388_v29, %v2638_v28 }
 0x14b   : >> { %v1541_v37 = vsel %vm448_vm7, %v2605_v44, %v1377_v58  ;;  %v1210_v38 = vsel %vm735_vm9, %v2620_v23, %v1046_v39  ;;  %vm737_vm13 = vcmp.eq.s32.totalorder %v4388_v29, %v2641_v15  ;;  %vm882_vm14 = vcmp.eq.s32.totalorder %v4388_v29, %v2648_v30 }
 0x14c   : >> { %1693 = vmatprep.subr.mxu1 %v1541_v37  ;;  %v1374_v60 = vsel %vm590_vm8, %v2629_v53, %v1210_v38  ;;  %vm447_vm15 = vcmp.eq.s32.totalorder %v4388_v29, %v2635_v47  ;;  %v1048_v55 = vsel %vm882_vm14, %v2667_v59, 0.0  ;;  %vm587_vm0 = vcmp.eq.s32.totalorder %v4389_v2, %v2541_v1 }
 0x14d   : >> { %v1538_v58 = vsel %vm445_vm11, %v2645_v48, %v1374_v60  ;;  %v1212_v39 = vsel %vm737_vm13, %v2681_v40, %v1048_v55  ;;  %vm732_vm1 = vcmp.eq.s32.totalorder %v4389_v2, %v2544_v41  ;;  %vm877_vm2 = vcmp.eq.s32.totalorder %v4389_v2, %v2547_v42 }
 0x14e   : >> { %1623 = vmatpush2.msra.mxu0 %v1538_v58  ;;  %v1376_v37 = vsel %vm592_vm12, %v2688_v24, %v1212_v39  ;;  %vm442_vm3 = vcmp.eq.s32.totalorder %v4389_v2, %v2524_v57  ;;  %v1043_v38 = vsel %vm877_vm2, %v2527_v61, 0.0  ;;  %vm589_vm4 = vcmp.eq.s32.totalorder %v4389_v2, %v2553_v45 }
 0x14f   : >> { %v1540_v60 = vsel %vm447_vm15, %v2691_v49, %v1376_v37  ;;  %v1207_v55 = vsel %vm732_vm1, %v2530_v62, %v1043_v38  ;;  %vm734_vm5 = vcmp.eq.s32.totalorder %v4389_v2, %v2556_v50  ;;  %vm879_vm6 = vcmp.eq.s32.totalorder %v4389_v2, %v2559_v51 }
 0x150   : >> { %1694 = vmatpush2.msra.mxu1 %v1540_v60  ;;  %v1371_v58 = vsel %vm587_vm0, %v2533_v63, %v1207_v55  ;;  %vm444_vm7 = vcmp.eq.s32.totalorder %v4389_v2, %v2550_v43  ;;  %v1045_v39 = vsel %vm879_vm6, %v2568_v52, 0.0  ;;  %vm586_vm8 = vcmp.eq.s32.totalorder %v4389_v2, %v2598_v26 }
 0x151   : >> { %v1535_v37 = vsel %vm442_vm3, %v2536_v0, %v1371_v58  ;;  %v1209_v38 = vsel %vm734_vm5, %v2581_v21, %v1045_v39  ;;  %vm731_vm9 = vcmp.eq.s32.totalorder %v4389_v2, %v2601_v56  ;;  %vm876_vm10 = vcmp.eq.s32.totalorder %v4389_v2, %v2610_v27 }
 0x152   : >> { %1624 = vmatprep.subr.mxu0 %v1535_v37  ;;  %v1373_v60 = vsel %vm589_vm4, %v2584_v54, %v1209_v38  ;;  %vm441_vm11 = vcmp.eq.s32.totalorder %v4389_v2, %v2590_v25  ;;  %v1042_v55 = vsel %vm876_vm10, %v2617_v22, 0.0  ;;  %vm588_vm12 = vcmp.eq.s32.totalorder %v4389_v2, %v2638_v28 }
 0x153   : >> { %v1537_v58 = vsel %vm444_vm7, %v2605_v44, %v1373_v60  ;;  %v1206_v39 = vsel %vm731_vm9, %v2620_v23, %v1042_v55  ;;  %vm733_vm13 = vcmp.eq.s32.totalorder %v4389_v2, %v2641_v15  ;;  %vm878_vm14 = vcmp.eq.s32.totalorder %v4389_v2, %v2648_v30 }
 0x154   : >> { %1695 = vmatprep.subr.mxu1 %v1537_v58  ;;  %v1370_v37 = vsel %vm586_vm8, %v2629_v53, %v1206_v39  ;;  %vm443_vm15 = vcmp.eq.s32.totalorder %v4389_v2, %v2635_v47  ;;  %v1044_v38 = vsel %vm878_vm14, %v2667_v59, 0.0  ;;  %vm583_vm0 = vcmp.eq.s32.totalorder %v4390_v3, %v2541_v1  ;;  %v4391_v2 = vld [vmem:[#allocation32_spill] sm:$0xff] }
 0x155   : >> { %v1534_v60 = vsel %vm441_vm11, %v2645_v48, %v1370_v37  ;;  %v1208_v55 = vsel %vm733_vm13, %v2681_v40, %v1044_v38  ;;  %vm728_vm1 = vcmp.eq.s32.totalorder %v4390_v3, %v2544_v41  ;;  %vm873_vm2 = vcmp.eq.s32.totalorder %v4390_v3, %v2547_v42 }
 0x156   : >> { %1625 = vmatpush2.msra.mxu0 %v1534_v60  ;;  %v1372_v58 = vsel %vm588_vm12, %v2688_v24, %v1208_v55  ;;  %vm438_vm3 = vcmp.eq.s32.totalorder %v4390_v3, %v2524_v57  ;;  %v1039_v39 = vsel %vm873_vm2, %v2527_v61, 0.0  ;;  %vm585_vm4 = vcmp.eq.s32.totalorder %v4390_v3, %v2553_v45 }
 0x157   : >> { %v1536_v37 = vsel %vm443_vm15, %v2691_v49, %v1372_v58  ;;  %v1203_v38 = vsel %vm728_vm1, %v2530_v62, %v1039_v39  ;;  %vm730_vm5 = vcmp.eq.s32.totalorder %v4390_v3, %v2556_v50  ;;  %vm875_vm6 = vcmp.eq.s32.totalorder %v4390_v3, %v2559_v51 }
 0x158   : >> { %1696 = vmatpush2.msra.mxu1 %v1536_v37  ;;  %v1367_v60 = vsel %vm583_vm0, %v2533_v63, %v1203_v38  ;;  %vm440_vm7 = vcmp.eq.s32.totalorder %v4390_v3, %v2550_v43  ;;  %v1041_v55 = vsel %vm875_vm6, %v2568_v52, 0.0  ;;  %vm582_vm8 = vcmp.eq.s32.totalorder %v4390_v3, %v2598_v26 }
 0x159   : >> { %v1531_v58 = vsel %vm438_vm3, %v2536_v0, %v1367_v60  ;;  %v1205_v39 = vsel %vm730_vm5, %v2581_v21, %v1041_v55  ;;  %vm727_vm9 = vcmp.eq.s32.totalorder %v4390_v3, %v2601_v56  ;;  %vm872_vm10 = vcmp.eq.s32.totalorder %v4390_v3, %v2610_v27 }
 0x15a   : >> { %1626 = vmatprep.subr.mxu0 %v1531_v58  ;;  %v1369_v37 = vsel %vm585_vm4, %v2584_v54, %v1205_v39  ;;  %vm437_vm11 = vcmp.eq.s32.totalorder %v4390_v3, %v2590_v25  ;;  %v1038_v38 = vsel %vm872_vm10, %v2617_v22, 0.0  ;;  %vm584_vm12 = vcmp.eq.s32.totalorder %v4390_v3, %v2638_v28 }
 0x15b   : >> { %v1533_v60 = vsel %vm440_vm7, %v2605_v44, %v1369_v37  ;;  %v1202_v55 = vsel %vm727_vm9, %v2620_v23, %v1038_v38  ;;  %vm729_vm13 = vcmp.eq.s32.totalorder %v4390_v3, %v2641_v15  ;;  %vm874_vm14 = vcmp.eq.s32.totalorder %v4390_v3, %v2648_v30 }
 0x15c   : >> { %1697 = vmatprep.subr.mxu1 %v1533_v60  ;;  %v1366_v58 = vsel %vm582_vm8, %v2629_v53, %v1202_v55  ;;  %vm439_vm15 = vcmp.eq.s32.totalorder %v4390_v3, %v2635_v47  ;;  %v1040_v39 = vsel %vm874_vm14, %v2667_v59, 0.0  ;;  %vm579_vm0 = vcmp.eq.s32.totalorder %v4391_v2, %v2541_v1  ;;  %v4392_v3 = vld [vmem:[#allocation31_spill] sm:$0xff] }
 0x15d   : >> { %v1530_v37 = vsel %vm437_vm11, %v2645_v48, %v1366_v58  ;;  %v1204_v38 = vsel %vm729_vm13, %v2681_v40, %v1040_v39  ;;  %vm724_vm1 = vcmp.eq.s32.totalorder %v4391_v2, %v2544_v41  ;;  %vm869_vm2 = vcmp.eq.s32.totalorder %v4391_v2, %v2547_v42 }
 0x15e   : >> { %1627 = vmatpush2.msra.mxu0 %v1530_v37  ;;  %v1368_v60 = vsel %vm584_vm12, %v2688_v24, %v1204_v38  ;;  %vm434_vm3 = vcmp.eq.s32.totalorder %v4391_v2, %v2524_v57  ;;  %v1035_v55 = vsel %vm869_vm2, %v2527_v61, 0.0  ;;  %vm581_vm4 = vcmp.eq.s32.totalorder %v4391_v2, %v2553_v45 }
 0x15f   : >> { %v1532_v58 = vsel %vm439_vm15, %v2691_v49, %v1368_v60  ;;  %v1199_v39 = vsel %vm724_vm1, %v2530_v62, %v1035_v55  ;;  %vm726_vm5 = vcmp.eq.s32.totalorder %v4391_v2, %v2556_v50  ;;  %vm871_vm6 = vcmp.eq.s32.totalorder %v4391_v2, %v2559_v51 }
 0x160   : >> { %1698 = vmatpush2.msra.mxu1 %v1532_v58  ;;  %v1363_v37 = vsel %vm579_vm0, %v2533_v63, %v1199_v39  ;;  %vm436_vm7 = vcmp.eq.s32.totalorder %v4391_v2, %v2550_v43  ;;  %v1037_v38 = vsel %vm871_vm6, %v2568_v52, 0.0  ;;  %vm578_vm8 = vcmp.eq.s32.totalorder %v4391_v2, %v2598_v26 }
 0x161   : >> { %v1527_v60 = vsel %vm434_vm3, %v2536_v0, %v1363_v37  ;;  %v1201_v55 = vsel %vm726_vm5, %v2581_v21, %v1037_v38  ;;  %vm723_vm9 = vcmp.eq.s32.totalorder %v4391_v2, %v2601_v56  ;;  %vm868_vm10 = vcmp.eq.s32.totalorder %v4391_v2, %v2610_v27 }
 0x162   : >> { %1628 = vmatprep.subr.mxu0 %v1527_v60  ;;  %v1365_v58 = vsel %vm581_vm4, %v2584_v54, %v1201_v55  ;;  %vm433_vm11 = vcmp.eq.s32.totalorder %v4391_v2, %v2590_v25  ;;  %v1034_v39 = vsel %vm868_vm10, %v2617_v22, 0.0  ;;  %vm580_vm12 = vcmp.eq.s32.totalorder %v4391_v2, %v2638_v28 }
 0x163   : >> { %v1529_v37 = vsel %vm436_vm7, %v2605_v44, %v1365_v58  ;;  %v1198_v38 = vsel %vm723_vm9, %v2620_v23, %v1034_v39  ;;  %vm725_vm13 = vcmp.eq.s32.totalorder %v4391_v2, %v2641_v15  ;;  %vm870_vm14 = vcmp.eq.s32.totalorder %v4391_v2, %v2648_v30 }
 0x164   : >> { %1699 = vmatprep.subr.mxu1 %v1529_v37  ;;  %v1362_v60 = vsel %vm578_vm8, %v2629_v53, %v1198_v38  ;;  %vm435_vm15 = vcmp.eq.s32.totalorder %v4391_v2, %v2635_v47  ;;  %v1036_v55 = vsel %vm870_vm14, %v2667_v59, 0.0  ;;  %vm575_vm0 = vcmp.eq.s32.totalorder %v4392_v3, %v2541_v1  ;;  %v4393_v2 = vld [vmem:[#allocation30_spill] sm:$0xff] }
 0x165   : >> { %v1526_v58 = vsel %vm433_vm11, %v2645_v48, %v1362_v60  ;;  %v1200_v39 = vsel %vm725_vm13, %v2681_v40, %v1036_v55  ;;  %vm720_vm1 = vcmp.eq.s32.totalorder %v4392_v3, %v2544_v41  ;;  %vm865_vm2 = vcmp.eq.s32.totalorder %v4392_v3, %v2547_v42 }
 0x166   : >> { %1629 = vmatpush2.msra.mxu0 %v1526_v58  ;;  %v1364_v37 = vsel %vm580_vm12, %v2688_v24, %v1200_v39  ;;  %vm430_vm3 = vcmp.eq.s32.totalorder %v4392_v3, %v2524_v57  ;;  %v1031_v38 = vsel %vm865_vm2, %v2527_v61, 0.0  ;;  %vm577_vm4 = vcmp.eq.s32.totalorder %v4392_v3, %v2553_v45 }
 0x167   : >> { %v1528_v60 = vsel %vm435_vm15, %v2691_v49, %v1364_v37  ;;  %v1195_v55 = vsel %vm720_vm1, %v2530_v62, %v1031_v38  ;;  %vm722_vm5 = vcmp.eq.s32.totalorder %v4392_v3, %v2556_v50  ;;  %vm867_vm6 = vcmp.eq.s32.totalorder %v4392_v3, %v2559_v51 }
 0x168   : >> { %1700 = vmatpush2.msra.mxu1 %v1528_v60  ;;  %v1359_v58 = vsel %vm575_vm0, %v2533_v63, %v1195_v55  ;;  %vm432_vm7 = vcmp.eq.s32.totalorder %v4392_v3, %v2550_v43  ;;  %v1033_v39 = vsel %vm867_vm6, %v2568_v52, 0.0  ;;  %vm574_vm8 = vcmp.eq.s32.totalorder %v4392_v3, %v2598_v26 }
 0x169   : >> { %v1523_v37 = vsel %vm430_vm3, %v2536_v0, %v1359_v58  ;;  %v1197_v38 = vsel %vm722_vm5, %v2581_v21, %v1033_v39  ;;  %vm719_vm9 = vcmp.eq.s32.totalorder %v4392_v3, %v2601_v56  ;;  %vm864_vm10 = vcmp.eq.s32.totalorder %v4392_v3, %v2610_v27 }
 0x16a   : >> { %1630 = vmatprep.subr.mxu0 %v1523_v37  ;;  %v1361_v60 = vsel %vm577_vm4, %v2584_v54, %v1197_v38  ;;  %vm429_vm11 = vcmp.eq.s32.totalorder %v4392_v3, %v2590_v25  ;;  %v1030_v55 = vsel %vm864_vm10, %v2617_v22, 0.0  ;;  %vm576_vm12 = vcmp.eq.s32.totalorder %v4392_v3, %v2638_v28 }
 0x16b   : >> { %v1525_v58 = vsel %vm432_vm7, %v2605_v44, %v1361_v60  ;;  %v1194_v39 = vsel %vm719_vm9, %v2620_v23, %v1030_v55  ;;  %vm721_vm13 = vcmp.eq.s32.totalorder %v4392_v3, %v2641_v15  ;;  %vm866_vm14 = vcmp.eq.s32.totalorder %v4392_v3, %v2648_v30 }
 0x16c   : >> { %1701 = vmatprep.subr.mxu1 %v1525_v58  ;;  %v1358_v37 = vsel %vm574_vm8, %v2629_v53, %v1194_v39  ;;  %vm431_vm15 = vcmp.eq.s32.totalorder %v4392_v3, %v2635_v47  ;;  %v1032_v38 = vsel %vm866_vm14, %v2667_v59, 0.0  ;;  %vm571_vm0 = vcmp.eq.s32.totalorder %v4393_v2, %v2541_v1  ;;  %v4394_v3 = vld [vmem:[#allocation28_spill] sm:$0xff] }
 0x16d   : >> { %v1522_v60 = vsel %vm429_vm11, %v2645_v48, %v1358_v37  ;;  %v1196_v55 = vsel %vm721_vm13, %v2681_v40, %v1032_v38  ;;  %vm716_vm1 = vcmp.eq.s32.totalorder %v4393_v2, %v2544_v41  ;;  %vm861_vm2 = vcmp.eq.s32.totalorder %v4393_v2, %v2547_v42 }
 0x16e   : >> { %1631 = vmatpush2.msra.mxu0 %v1522_v60  ;;  %v1360_v58 = vsel %vm576_vm12, %v2688_v24, %v1196_v55  ;;  %vm426_vm3 = vcmp.eq.s32.totalorder %v4393_v2, %v2524_v57  ;;  %v1027_v39 = vsel %vm861_vm2, %v2527_v61, 0.0  ;;  %vm573_vm4 = vcmp.eq.s32.totalorder %v4393_v2, %v2553_v45 }
 0x16f   : >> { %v1524_v37 = vsel %vm431_vm15, %v2691_v49, %v1360_v58  ;;  %v1191_v38 = vsel %vm716_vm1, %v2530_v62, %v1027_v39  ;;  %vm718_vm5 = vcmp.eq.s32.totalorder %v4393_v2, %v2556_v50  ;;  %vm863_vm6 = vcmp.eq.s32.totalorder %v4393_v2, %v2559_v51 }
 0x170   : >> { %1702 = vmatpush2.msra.mxu1 %v1524_v37  ;;  %v1355_v60 = vsel %vm571_vm0, %v2533_v63, %v1191_v38  ;;  %vm428_vm7 = vcmp.eq.s32.totalorder %v4393_v2, %v2550_v43  ;;  %v1029_v55 = vsel %vm863_vm6, %v2568_v52, 0.0  ;;  %vm570_vm8 = vcmp.eq.s32.totalorder %v4393_v2, %v2598_v26 }
 0x171   : >> { %v1519_v58 = vsel %vm426_vm3, %v2536_v0, %v1355_v60  ;;  %v1193_v39 = vsel %vm718_vm5, %v2581_v21, %v1029_v55  ;;  %vm715_vm9 = vcmp.eq.s32.totalorder %v4393_v2, %v2601_v56  ;;  %vm860_vm10 = vcmp.eq.s32.totalorder %v4393_v2, %v2610_v27 }
 0x172   : >> { %1632 = vmatprep.subr.mxu0 %v1519_v58  ;;  %v1357_v37 = vsel %vm573_vm4, %v2584_v54, %v1193_v39  ;;  %vm425_vm11 = vcmp.eq.s32.totalorder %v4393_v2, %v2590_v25  ;;  %v1026_v38 = vsel %vm860_vm10, %v2617_v22, 0.0  ;;  %vm572_vm12 = vcmp.eq.s32.totalorder %v4393_v2, %v2638_v28 }
 0x173   : >> { %v1521_v60 = vsel %vm428_vm7, %v2605_v44, %v1357_v37  ;;  %v1190_v55 = vsel %vm715_vm9, %v2620_v23, %v1026_v38  ;;  %vm717_vm13 = vcmp.eq.s32.totalorder %v4393_v2, %v2641_v15  ;;  %vm862_vm14 = vcmp.eq.s32.totalorder %v4393_v2, %v2648_v30 }
 0x174   : >> { %1703 = vmatprep.subr.mxu1 %v1521_v60  ;;  %v1354_v58 = vsel %vm570_vm8, %v2629_v53, %v1190_v55  ;;  %vm427_vm15 = vcmp.eq.s32.totalorder %v4393_v2, %v2635_v47  ;;  %v1028_v39 = vsel %vm862_vm14, %v2667_v59, 0.0  ;;  %vm567_vm0 = vcmp.eq.s32.totalorder %v4394_v3, %v2541_v1  ;;  %v4395_v2 = vld [vmem:[#allocation27_spill] sm:$0xff] }
 0x175   : >> { %v1518_v37 = vsel %vm425_vm11, %v2645_v48, %v1354_v58  ;;  %v1192_v38 = vsel %vm717_vm13, %v2681_v40, %v1028_v39  ;;  %vm712_vm1 = vcmp.eq.s32.totalorder %v4394_v3, %v2544_v41  ;;  %vm857_vm2 = vcmp.eq.s32.totalorder %v4394_v3, %v2547_v42 }
 0x176   : >> { %1633 = vmatpush2.msra.mxu0 %v1518_v37  ;;  %v1356_v60 = vsel %vm572_vm12, %v2688_v24, %v1192_v38  ;;  %vm422_vm3 = vcmp.eq.s32.totalorder %v4394_v3, %v2524_v57  ;;  %v1023_v55 = vsel %vm857_vm2, %v2527_v61, 0.0  ;;  %vm569_vm4 = vcmp.eq.s32.totalorder %v4394_v3, %v2553_v45 }
 0x177   : >> { %v1520_v58 = vsel %vm427_vm15, %v2691_v49, %v1356_v60  ;;  %v1187_v39 = vsel %vm712_vm1, %v2530_v62, %v1023_v55  ;;  %vm714_vm5 = vcmp.eq.s32.totalorder %v4394_v3, %v2556_v50  ;;  %vm859_vm6 = vcmp.eq.s32.totalorder %v4394_v3, %v2559_v51 }
 0x178   : >> { %1704 = vmatpush2.msra.mxu1 %v1520_v58  ;;  %v1351_v37 = vsel %vm567_vm0, %v2533_v63, %v1187_v39  ;;  %vm424_vm7 = vcmp.eq.s32.totalorder %v4394_v3, %v2550_v43  ;;  %v1025_v38 = vsel %vm859_vm6, %v2568_v52, 0.0  ;;  %vm566_vm8 = vcmp.eq.s32.totalorder %v4394_v3, %v2598_v26 }
 0x179   : >> { %v1515_v60 = vsel %vm422_vm3, %v2536_v0, %v1351_v37  ;;  %v1189_v55 = vsel %vm714_vm5, %v2581_v21, %v1025_v38  ;;  %vm711_vm9 = vcmp.eq.s32.totalorder %v4394_v3, %v2601_v56  ;;  %vm856_vm10 = vcmp.eq.s32.totalorder %v4394_v3, %v2610_v27 }
 0x17a   : >> { %1634 = vmatprep.subr.mxu0 %v1515_v60  ;;  %v1353_v58 = vsel %vm569_vm4, %v2584_v54, %v1189_v55  ;;  %vm421_vm11 = vcmp.eq.s32.totalorder %v4394_v3, %v2590_v25  ;;  %v1022_v39 = vsel %vm856_vm10, %v2617_v22, 0.0  ;;  %vm568_vm12 = vcmp.eq.s32.totalorder %v4394_v3, %v2638_v28 }
 0x17b   : >> { %v1517_v37 = vsel %vm424_vm7, %v2605_v44, %v1353_v58  ;;  %v1186_v38 = vsel %vm711_vm9, %v2620_v23, %v1022_v39  ;;  %vm713_vm13 = vcmp.eq.s32.totalorder %v4394_v3, %v2641_v15  ;;  %vm858_vm14 = vcmp.eq.s32.totalorder %v4394_v3, %v2648_v30 }
 0x17c   : >> { %1705 = vmatprep.subr.mxu1 %v1517_v37  ;;  %v1350_v60 = vsel %vm566_vm8, %v2629_v53, %v1186_v38  ;;  %vm423_vm15 = vcmp.eq.s32.totalorder %v4394_v3, %v2635_v47  ;;  %v1024_v55 = vsel %vm858_vm14, %v2667_v59, 0.0  ;;  %vm563_vm0 = vcmp.eq.s32.totalorder %v4395_v2, %v2541_v1  ;;  %v4396_v3 = vld [vmem:[#allocation26_spill] sm:$0xff] }
 0x17d   : >> { %v1514_v58 = vsel %vm421_vm11, %v2645_v48, %v1350_v60  ;;  %v1188_v39 = vsel %vm713_vm13, %v2681_v40, %v1024_v55  ;;  %vm708_vm1 = vcmp.eq.s32.totalorder %v4395_v2, %v2544_v41  ;;  %vm853_vm2 = vcmp.eq.s32.totalorder %v4395_v2, %v2547_v42 }
 0x17e   : >> { %1635 = vmatpush2.msra.mxu0 %v1514_v58  ;;  %v1352_v37 = vsel %vm568_vm12, %v2688_v24, %v1188_v39  ;;  %vm418_vm3 = vcmp.eq.s32.totalorder %v4395_v2, %v2524_v57  ;;  %v1019_v38 = vsel %vm853_vm2, %v2527_v61, 0.0  ;;  %vm565_vm4 = vcmp.eq.s32.totalorder %v4395_v2, %v2553_v45 }
 0x17f   : >> { %v1516_v60 = vsel %vm423_vm15, %v2691_v49, %v1352_v37  ;;  %v1183_v55 = vsel %vm708_vm1, %v2530_v62, %v1019_v38  ;;  %vm710_vm5 = vcmp.eq.s32.totalorder %v4395_v2, %v2556_v50  ;;  %vm855_vm6 = vcmp.eq.s32.totalorder %v4395_v2, %v2559_v51 }
 0x180   : >> { %1706 = vmatpush2.msra.mxu1 %v1516_v60  ;;  %v1347_v58 = vsel %vm563_vm0, %v2533_v63, %v1183_v55  ;;  %vm420_vm7 = vcmp.eq.s32.totalorder %v4395_v2, %v2550_v43  ;;  %v1021_v39 = vsel %vm855_vm6, %v2568_v52, 0.0  ;;  %vm562_vm8 = vcmp.eq.s32.totalorder %v4395_v2, %v2598_v26 }
 0x181   : >> { %v1511_v37 = vsel %vm418_vm3, %v2536_v0, %v1347_v58  ;;  %v1185_v38 = vsel %vm710_vm5, %v2581_v21, %v1021_v39  ;;  %vm707_vm9 = vcmp.eq.s32.totalorder %v4395_v2, %v2601_v56  ;;  %vm852_vm10 = vcmp.eq.s32.totalorder %v4395_v2, %v2610_v27 }
 0x182   : >> { %1636 = vmatprep.subr.mxu0 %v1511_v37  ;;  %v1349_v60 = vsel %vm565_vm4, %v2584_v54, %v1185_v38  ;;  %vm417_vm11 = vcmp.eq.s32.totalorder %v4395_v2, %v2590_v25  ;;  %v1018_v55 = vsel %vm852_vm10, %v2617_v22, 0.0  ;;  %vm564_vm12 = vcmp.eq.s32.totalorder %v4395_v2, %v2638_v28 }
 0x183   : >> { %v1513_v58 = vsel %vm420_vm7, %v2605_v44, %v1349_v60  ;;  %v1182_v39 = vsel %vm707_vm9, %v2620_v23, %v1018_v55  ;;  %vm709_vm13 = vcmp.eq.s32.totalorder %v4395_v2, %v2641_v15  ;;  %vm854_vm14 = vcmp.eq.s32.totalorder %v4395_v2, %v2648_v30 }
 0x184   : >> { %1707 = vmatprep.subr.mxu1 %v1513_v58  ;;  %v1346_v37 = vsel %vm562_vm8, %v2629_v53, %v1182_v39  ;;  %vm419_vm15 = vcmp.eq.s32.totalorder %v4395_v2, %v2635_v47  ;;  %v1020_v38 = vsel %vm854_vm14, %v2667_v59, 0.0  ;;  %vm559_vm0 = vcmp.eq.s32.totalorder %v4396_v3, %v2541_v1 }
 0x185   : >> { %v1510_v60 = vsel %vm417_vm11, %v2645_v48, %v1346_v37  ;;  %v1184_v55 = vsel %vm709_vm13, %v2681_v40, %v1020_v38  ;;  %vm704_vm1 = vcmp.eq.s32.totalorder %v4396_v3, %v2544_v41  ;;  %vm849_vm2 = vcmp.eq.s32.totalorder %v4396_v3, %v2547_v42  ;;  %v1572_v41 = vld [vmem:[%s2488_s12] sm:$0xff] }
 0x186   : >> { %1637 = vmatpush2.msra.mxu0 %v1510_v60  ;;  %v1348_v58 = vsel %vm564_vm12, %v2688_v24, %v1184_v55  ;;  %vm414_vm3 = vcmp.eq.s32.totalorder %v4396_v3, %v2524_v57  ;;  %v1015_v39 = vsel %vm849_vm2, %v2527_v61, 0.0  ;;  %vm561_vm4 = vcmp.eq.s32.totalorder %v4396_v3, %v2553_v45 }
 0x187   : >> { %v1512_v37 = vsel %vm419_vm15, %v2691_v49, %v1348_v58  ;;  %v1179_v38 = vsel %vm704_vm1, %v2530_v62, %v1015_v39  ;;  %vm706_vm5 = vcmp.eq.s32.totalorder %v4396_v3, %v2556_v50  ;;  %vm851_vm6 = vcmp.eq.s32.totalorder %v4396_v3, %v2559_v51 }
 0x188   : >> { %1708 = vmatpush2.msra.mxu1 %v1512_v37  ;;  %v1343_v57 = vsel %vm559_vm0, %v2533_v63, %v1179_v38  ;;  %vm416_vm7 = vcmp.eq.s32.totalorder %v4396_v3, %v2550_v43  ;;  %v1017_v61 = vsel %vm851_vm6, %v2568_v52, 0.0  ;;  %vm558_vm8 = vcmp.eq.s32.totalorder %v4396_v3, %v2598_v26 }
 0x189   : >> { %v1507_v62 = vsel %vm414_vm3, %v2536_v0, %v1343_v57  ;;  %v1181_v42 = vsel %vm706_vm5, %v2581_v21, %v1017_v61  ;;  %vm703_vm9 = vcmp.eq.s32.totalorder %v4396_v3, %v2601_v56  ;;  %vm848_vm10 = vcmp.eq.s32.totalorder %v4396_v3, %v2610_v27 }
 0x18a   : >> { %1638 = vmatprep.subr.mxu0 %v1507_v62  ;;  %v1345_v63 = vsel %vm561_vm4, %v2584_v54, %v1181_v42  ;;  %vm413_vm11 = vcmp.eq.s32.totalorder %v4396_v3, %v2590_v25  ;;  %v1014_v26 = vsel %vm848_vm10, %v2617_v22, 0.0  ;;  %v1574_v0 = vcombine.high %v1572_v41, %v1572_v41  ;;  %v1571_v22 = vld [vmem:[#allocation4 + $0x8] sm:$0xff] }
 0x18b   : >> { %v1509_v21 = vsel %vm416_vm7, %v2605_v44, %v1345_v63  ;;  %v1178_v1 = vsel %vm703_vm9, %v2620_v23, %v1014_v26  ;;  %vm705_vm12 = vcmp.eq.s32.totalorder %v4396_v3, %v2641_v15  ;;  %vm560_vm13 = vcmp.eq.s32.totalorder %v4396_v3, %v2638_v28 }
 0x18c   : >> { %1709 = vmatprep.subr.mxu1 %v1509_v21  ;;  %v1342_v27 = vsel %vm558_vm8, %v2629_v53, %v1178_v1  ;;  %1640 = vmatprep.mubr.f32.mxu0 %v1574_v0  ;;  %vm850_vm14 = vcmp.eq.s32.totalorder %v4396_v3, %v2648_v30  ;;  %vm415_vm15 = vcmp.eq.s32.totalorder %v4396_v3, %v2635_v47  ;;  %v1570_v30 = vld [vmem:[#allocation4] sm:$0xff] }
 0x18d   : >> { %v1506_v25 = vsel %vm413_vm11, %v2645_v48, %v1342_v27  ;;  %v1016_v43 = vsel %vm850_vm14, %v2667_v59, 0.0  ;;  %1711 = vmatprep.mubr.f32.mxu1 %v1574_v0 }
 0x18e   : >> { %1639 = vmatpush2.msra.mxu0 %v1506_v25  ;;  %v1180_v45 = vsel %vm705_vm12, %v2681_v40, %v1016_v43 }
 0x18f   : >> { %v1344_v50 = vsel %vm560_vm13, %v2688_v24, %v1180_v45  ;;  %1641 = vmatmul.mubr.f32.vlgmr.msra.gmra.mxu0 %v1572_v41 }
 0x190   : >> { %v1508_v51 = vsel %vm415_vm15, %v2691_v49, %v1344_v50 }
 0x191   : >> { %1710 = vmatpush2.msra.mxu1 %v1508_v51 }
 0x192   : >> { %1712 = vmatmul.mubr.f32.vlgmr.msra.gmra.mxu1 %v1572_v41 }
 0x24f   : >> { %v1642_v28 = vpop.f32.mrf.mxu0 }
 0x251   : >> { %v1644_v52 = vpop.f32.mrf.mxu0 }
 0x252   : >> { %v1713_v54 = vpop.f32.mrf.mxu1  ;;  %v1722_v56 = vcombine.low %v1642_v28, %v1644_v52 }
 0x254   : >> { %v1726_v44 = vadd.f32 %v1722_v56, %v1570_v30  ;;  %v1715_v23 = vpop.f32.mrf.mxu1 }
 0x255   : >> { %v1723_v53 = vcombine.low %v1713_v54, %v1715_v23  ;;  %294 = sbr.rel (!%p4398_p9) target bundleno = 108 (0x6c), region = 102 }
 0x256   : >> { %1728 = vst [vmem:[#allocation4] sm:$0xff] %v1726_v44 }
 0x257   : >> { %v1727_v47 = vadd.f32 %v1723_v53, %v1571_v22 }
 0x259   : >> { %1729 = vst [vmem:[#allocation4 + $0x8] sm:$0xff] %v1727_v47 }
 0x25a PF: > { %s1919_s3 = sshll.u32 %s2179_s29, 8  ;;  %s1751_s19 = sshll.u32 %s2476_s20, 4  ;;  %s1752_s19 = int_to_ptr.vmem [resolvable:$true] %s1751_s19 }
 0x25b   : > { %s1749_s18 = scalar_lea.hbm %s4331_s5, %s1919_s3  ;;  %s1735_s22 = scalar_lea.sflag [#allocation10], %s2321_s11 }
 0x25c   : > { %s2099_s12 = scalar_lea.vmem %s1752_s19, 256  ;;  %s2198_s23 = smov [#allocation11]  }
 0x25d   : > { %v1730_v15 = vld [vmem:[#allocation4] sm:$0xff]  ;;  %p2100_p7 = scmp.ne.s32.totalorder %s1752_s19, %s2099_s12  ;;  %s2103_s7 = sshll.u32 %s2198_s23, 4  ;;  %s2104_s7 = int_to_ptr.vmem [resolvable:$false] %s2103_s7 }
 0x25e   : > { %1732 = vst [vmem:[%s2476_s20] sm:$0xff] %v1730_v15  ;;  %s2105_s10 = scalar_lea.vmem %s2104_s7, 512  ;;  %p2106_p12 = scmp.lt.s32.totalorder %s1752_s19, %s2104_s7 }
 0x25f   : > { %p2101_p10 = pnand %p2100_p7, %p2286_p5  ;;  %p2107_p13 = scmp.lt.s32.totalorder %s2105_s10, %s2099_s12 }
 0x260   : > { %v1731_v48 = vld [vmem:[#allocation4 + $0x8] sm:$0xff] }
 0x261   : > { %1733 = vst [vmem:[%s2476_s20 + $0x8] sm:$0xff] %v1731_v48  ;;  %p2102_p11 = pneg %p2101_p10  ;;  %p2108_p1 = por %p2107_p13, %p2106_p12 }
 0x263   : > { %p2109_p2 = pnand %p2108_p1, %p2102_p11 }
 0x265   : > { %2112 = shalt.err (!%p2109_p2)
}
 0x266   : > { %s2113_s29 = scalar_lea.hbm %s1749_s18, 256  ;;  %s2117_s17 = scalar_lea.hbm %s4331_s5, 512 }
 0x267   : > { %p2114_p3 = scmp.ne.s32.totalorder %s1749_s18, %s2113_s29  ;;  %p2118_p4 = scmp.lt.s32.totalorder %s1749_s18, %s4331_s5 }
 0x268   : > { %p2119_p8 = scmp.lt.s32.totalorder %s2117_s17, %s2113_s29 }
 0x269   : > { %p2115_p6 = pnand %p2114_p3, %p2286_p5 }
 0x26a   : > { %p2120_p9 = por %p2119_p8, %p2118_p4 }
 0x26b   : > { %p2116_p0 = pneg %p2115_p6 }
 0x26d   : > { %p2121_p7 = pnand %p2120_p9, %p2116_p0 }
 0x26f   : > { %2124 = shalt.err (!%p2121_p7)
}
 0x270   : > { %1924 = dma.vmem_to_hbm [thread:$0]  (%p2286_p5), %s1752_s19, 256, %s1749_s18, %s1735_s22  }
 0x271 PF: > { %s1763_s0 = sand.u32 1, %s2167_s1   ;;  %p4399_p10 = scmp.ne.s32.totalorder %s4361_s16, 0 }
 0x272   : > { %p4400_p11 = scmp.ge.s32.totalorder %s2187_s6, 2  ;;  %s1764_s25 = scalar_lea.sflag [#allocation10], %s1763_s0 }
 0x274   : > { %p1931_p12 = pnand %p4400_p11, %p4399_p10 }
 0x276   : > { %p1932_p13 = pneg %p1931_p12 }
 0x278   : > { %2162 = dma.done.wait (%p1932_p13), %s1764_s25, 256  }
 0x279   : > { %2164 = vsyncadd (%p1932_p13), %s1764_s25, 4294967040  ;;  %s31_s6 = sadd.s32 1, %s2187_s6   ;;  %s4401_s1 = smov %s2171_s27 }
 0x27a   : > { %p28_p1 = scmp.ge.s32.totalorder %s31_s6, 4   ;;  %s4402_s27 = smov %s2175_s28 }
 0x27b   : > { %s4403_s28 = smov %s2291_s15  ;;  %s4404_s29 = smov %s2183_s30 }
 0x27c   : > { %s4405_s30 = smov %s4407_s9  ;;  %30 = sbr.rel (!%p28_p1) target bundleno = 32 (0x20), region = 113 }
 0x281   :  { %1769 = vsyncpa [#allocation9], 1 }
 0x282   :  { %1771 = vsyncpa [#allocation9 + $0x1], 1 }
 0x283   :  { %1772 = vsyncpa [#allocation10], 1 }
 0x284   :  { %1774 = vsyncpa [#allocation10 + $0x1], 1 }
 0x285   :  { %1775 = vsyncmov [#allocation3] }
 0x288   :  { %s1776_s14 = vpop.sfrf %1775 }
 0x289   :  { %p1913_p5 = scmp.ne.s32.totalorder %s1776_s14, 0 }
 0x28b   :  { %1780 = shalt.err (%p1913_p5)  }
 0x28c   :  { %1782 = vsyncmov [#allocation3 + $0x1] }
 0x28f   :  { %s1783_s16 = vpop.sfrf %1782 }
 0x290   :  { %p1914_p2 = scmp.ne.s32.totalorder %s1783_s16, 0 }
 0x292   :  { %1787 = shalt.err (%p1914_p2)  }

</bundles_post_ra>
